<compile_context>
chip_gen: v6e
topology: v6e:2x2x1
jax: 0.10.0
libtpu: 0.0.40
codegen_flags: <defaults>
</compile_context>

<pallas_src>
import functools

import jax
import jax.numpy as jnp
from jax import lax
from jax.experimental import pallas as pl
from jax.experimental.pallas import tpu as pltpu


HIDDEN1, HIDDEN2, HIDDEN3 = 256, 256, 128


def _value_net_kernel(x_ref,
                      w1_ref, b1_ref,
                      w2_ref, b2_ref,
                      w3_ref, b3_ref,
                      w4_ref, b4_ref,
                      o_ref):
    cdt = w1_ref.dtype               # compute dtype of the MXU layers (bf16 or f32)

    x = x_ref[...].astype(cdt)                                           # (TB, obs)

    # Layer 1: contract obs of both operands -> feature-major (256, TB), f32 acc.
    h = lax.dot_general(w1_ref[...], x, (((1,), (1,)), ((), ())),
                        preferred_element_type=jnp.float32)              # (256, TB)
    h = jnp.maximum(h + b1_ref[...], 0.0).astype(cdt)                    # fused bias+ReLU+cast

    h = jnp.dot(w2_ref[...], h, preferred_element_type=jnp.float32)      # (256, TB)
    h = jnp.maximum(h + b2_ref[...], 0.0).astype(cdt)

    h = jnp.dot(w3_ref[...], h, preferred_element_type=jnp.float32)      # (128, TB)
    h = jnp.maximum(h + b3_ref[...], 0.0)                                # stay f32 for final layer

    # Final 128 -> 1 layer: VPU multiply + sublane (axis 0) reduction in f32.
    # Result is already lane-dense (1, TB): no MXU push, no masked store.
    v = jnp.sum(h * w4_ref[...], axis=0, keepdims=True) + b4_ref[...]    # (1, TB) f32
    o_ref[...] = v.astype(o_ref.dtype)


def _round_up(x, m):
    return ((x + m - 1) // m) * m


def _choose_block_b(B, max_block_b, compute_dtype):
    """Batch tile: multiple of 128, big enough to hide grid overhead, >=2 tiles
    when B allows (v7x has 2 TensorCores), capped for VMEM headroom."""
    cap = max_block_b
    if compute_dtype == jnp.float32:
        cap = min(cap, 1024)     # v5e scoped-VMEM default is 16 MiB; f32 tiles are 2x bf16
    half = _round_up(-(-B // 2), 128)          # round_up(cdiv(B, 2), 128)
    return max(128, min(cap, half))


@functools.partial(jax.jit, static_argnames=("max_block_b", "compute_dtype"))
def value_network_forward(x, params, *, max_block_b=2048, compute_dtype=jnp.bfloat16):
    """x: (B, obs) float32.  params: PyTorch-layout weights (out, in), biases (out,).

    compute_dtype=jnp.bfloat16 (f32 MXU accumulation) is recommended on v5e,
    v6e and v7x alike; jnp.float32 is the slow, accuracy-critical path.
    """
    f32 = jnp.float32
    B, obs = x.shape

    block_b = _choose_block_b(B, max_block_b, compute_dtype)
    n_tiles = pl.cdiv(B, block_b)
    Bp = n_tiles * block_b

    # Natural (batch, obs) layout; pad only the batch (zeros -> relu(bias) rows
    # that are sliced off at the end).  No obs padding, no transpose, no cast.
    x_in = x.astype(f32)
    if Bp != B:
        x_in = jnp.pad(x_in, ((0, Bp - B), (0, 0)))

    # PyTorch (out, in) weight layout is exactly what the feature-major kernel
    # wants (h_t = W @ prev_t).  Matmul weights in compute_dtype; the tiny
    # final-layer weight and all biases stay f32.
    w1 = params["w1"].astype(compute_dtype)                          # (256, obs)
    w2 = params["w2"].astype(compute_dtype)                          # (256, 256)
    w3 = params["w3"].astype(compute_dtype)                          # (128, 256)
    w4 = params["w4"].reshape(HIDDEN3, 1).astype(f32)                # (128, 1)
    b1 = params["b1"].reshape(HIDDEN1, 1).astype(f32)
    b2 = params["b2"].reshape(HIDDEN2, 1).astype(f32)
    b3 = params["b3"].reshape(HIDDEN3, 1).astype(f32)
    b4 = params["b4"].reshape(1, 1).astype(f32)

    def resident(arr):       # full-array block, same block every grid step -> VMEM resident
        return pl.BlockSpec(arr.shape, lambda i: (0, 0))

    out = pl.pallas_call(
        _value_net_kernel,
        out_shape=jax.ShapeDtypeStruct((1, Bp), f32),
        grid_spec=pltpu.PrefetchScalarGridSpec(
            num_scalar_prefetch=0,
            grid=(n_tiles,),
            in_specs=[
                pl.BlockSpec((block_b, obs), lambda i: (i, 0)),      # natural layout input
                resident(w1), resident(b1),
                resident(w2), resident(b2),
                resident(w3), resident(b3),
                resident(w4), resident(b4),
            ],
            out_specs=pl.BlockSpec((1, block_b), lambda i: (0, i)),  # lane-dense output slab
        ),
        compiler_params=pltpu.CompilerParams(
            dimension_semantics=("parallel",)),
    )(x_in, w1, b1, w2, b2, w3, b3, w4, b4)

    return out[0, :B].reshape(B, 1)


def init_params(key, obs_size):
    """Deterministic synthetic params in PyTorch nn.Linear layout: W (out, in), b (out,)."""
    dims = [(obs_size, HIDDEN1), (HIDDEN1, HIDDEN2), (HIDDEN2, HIDDEN3), (HIDDEN3, 1)]
    params = {}
    for idx, (fan_in, fan_out) in enumerate(dims, start=1):
        key, kw, kb = jax.random.split(key, 3)
        bound = 1.0 / jnp.sqrt(fan_in)   # matches nn.Linear default init range
        params[f"w{idx}"] = jax.random.uniform(
            kw, (fan_out, fan_in), jnp.float32, -bound, bound)
        params[f"b{idx}"] = jax.random.uniform(
            kb, (fan_out,), jnp.float32, -bound, bound)
    return params


def reference_forward(x, params, compute_dtype=jnp.bfloat16):
    """Plain-JAX reference with the same dtype policy as the kernel."""
    f32 = jnp.float32

    def linear(h, w, b, cast):
        if cast:
            h = h.astype(compute_dtype)
            w = w.astype(compute_dtype)
        return jnp.dot(h, w.T, preferred_element_type=f32) + b.astype(f32)

    h = jnp.maximum(linear(x, params["w1"], params["b1"], True), 0.0)
    h = jnp.maximum(linear(h, params["w2"], params["b2"], True), 0.0)
    h = jnp.maximum(linear(h, params["w3"], params["b3"], True), 0.0)
    return linear(h, params["w4"], params["b4"], False)     # final layer in f32


if __name__ == "__main__":
    obs_size = 48
    batch = 300          # deliberately not a multiple of 128 (exercises batch padding
                         # and still yields 2 grid tiles for the v7x megacore path)

    key = jax.random.PRNGKey(0)
    key, kx = jax.random.split(key)
    x = jax.random.normal(kx, (batch, obs_size), jnp.float32)
    params = init_params(key, obs_size)

    # Recommended path on all generations: bf16 matmuls, f32 accumulation/bias/ReLU.
    out_bf16 = jax.block_until_ready(
        value_network_forward(x, params, compute_dtype=jnp.bfloat16))
    ref_bf16 = reference_forward(x, params, compute_dtype=jnp.bfloat16)
    assert out_bf16.shape == (batch, 1)
    assert jnp.allclose(out_bf16, ref_bf16, atol=2e-2, rtol=2e-2), "bf16 path mismatch"

    # Full-precision path (accuracy-critical use only; ~3x MXU work on v5e).
    out_f32 = jax.block_until_ready(
        value_network_forward(x, params, compute_dtype=jnp.float32))
    ref_f32 = reference_forward(x, params, compute_dtype=jnp.float32)
    assert out_f32.shape == (batch, 1)
    assert jnp.allclose(out_f32, ref_f32, atol=1e-4, rtol=1e-4), "f32 path mismatch"

    print("KERNEL_OK")
</pallas_src>

<mosaic_0001>
module attributes {stable_mosaic.version = 11 : i64} {
  func.func @_value_net_kernel(%arg0: i32, %arg1: memref<256x48xf32, #tpu.memory_space<vmem>>, %arg2: memref<256x48xbf16, #tpu.memory_space<vmem>>, %arg3: memref<256x1xf32, #tpu.memory_space<vmem>>, %arg4: memref<256x256xbf16, #tpu.memory_space<vmem>>, %arg5: memref<256x1xf32, #tpu.memory_space<vmem>>, %arg6: memref<128x256xbf16, #tpu.memory_space<vmem>>, %arg7: memref<128x1xf32, #tpu.memory_space<vmem>>, %arg8: memref<128x1xf32, #tpu.memory_space<vmem>>, %arg9: memref<1x1xf32, #tpu.memory_space<vmem>>, %arg10: memref<1x256xf32, #tpu.memory_space<vmem>>) attributes {dimension_semantics = [#tpu.dimension_semantics<parallel>], iteration_bounds = array<i64: 2>, scalar_prefetch = 0 : i64, scratch_operands = 0 : i64, tpu.core_type = #tpu.core_type<tc>, window_params = [{transform_indices = @transform_0, window_bounds = array<i64: 256, 48>}, {pipeline_mode = #tpu.pipeline_mode<synchronous>, transform_indices = @transform_1, window_bounds = array<i64: 256, 48>}, {pipeline_mode = #tpu.pipeline_mode<synchronous>, transform_indices = @transform_2, window_bounds = array<i64: 256, 1>}, {pipeline_mode = #tpu.pipeline_mode<synchronous>, transform_indices = @transform_3, window_bounds = array<i64: 256, 256>}, {pipeline_mode = #tpu.pipeline_mode<synchronous>, transform_indices = @transform_4, window_bounds = array<i64: 256, 1>}, {pipeline_mode = #tpu.pipeline_mode<synchronous>, transform_indices = @transform_5, window_bounds = array<i64: 128, 256>}, {pipeline_mode = #tpu.pipeline_mode<synchronous>, transform_indices = @transform_6, window_bounds = array<i64: 128, 1>}, {pipeline_mode = #tpu.pipeline_mode<synchronous>, transform_indices = @transform_7, window_bounds = array<i64: 128, 1>}, {pipeline_mode = #tpu.pipeline_mode<synchronous>, transform_indices = @transform_8, window_bounds = array<i64: 1, 1>}, {transform_indices = @transform_9, window_bounds = array<i64: 1, 256>}]} {
    %c0 = arith.constant 0 : index
    %c0_0 = arith.constant 0 : index
    %0 = vector.load %arg1[%c0, %c0_0] : memref<256x48xf32, #tpu.memory_space<vmem>>, vector<256x48xf32>
    %1 = arith.truncf %0 : vector<256x48xf32> to vector<256x48xbf16>
    %c0_1 = arith.constant 0 : index
    %c0_2 = arith.constant 0 : index
    %2 = vector.load %arg2[%c0_1, %c0_2] : memref<256x48xbf16, #tpu.memory_space<vmem>>, vector<256x48xbf16>
    %cst = arith.constant dense<0.000000e+00> : vector<256x256xf32>
    %3 = tpu.matmul %2, %1, %cst {dimension_numbers = #tpu.dot_dimension_numbers<[1], [1], [0], [0], [0, 0, 1, 0], [], []>} : vector<256x48xbf16>, vector<256x48xbf16>, vector<256x256xf32> -> vector<256x256xf32>
    %c0_3 = arith.constant 0 : index
    %c0_4 = arith.constant 0 : index
    %4 = vector.load %arg3[%c0_3, %c0_4] : memref<256x1xf32, #tpu.memory_space<vmem>>, vector<256x1xf32>
    %5 = vector.broadcast %4 : vector<256x1xf32> to vector<256x256xf32>
    %6 = arith.addf %3, %5 : vector<256x256xf32>
    %cst_5 = arith.constant 0.000000e+00 : f32
    %7 = vector.broadcast %cst_5 : f32 to vector<256x256xf32>
    %8 = arith.maximumf %6, %7 : vector<256x256xf32>
    %9 = arith.truncf %8 : vector<256x256xf32> to vector<256x256xbf16>
    %c0_6 = arith.constant 0 : index
    %c0_7 = arith.constant 0 : index
    %10 = vector.load %arg4[%c0_6, %c0_7] : memref<256x256xbf16, #tpu.memory_space<vmem>>, vector<256x256xbf16>
    %cst_8 = arith.constant dense<0.000000e+00> : vector<256x256xf32>
    %11 = tpu.matmul %10, %9, %cst_8 {dimension_numbers = #tpu.dot_dimension_numbers<[1], [0], [0], [1], [0, 0, 1, 1], [], []>} : vector<256x256xbf16>, vector<256x256xbf16>, vector<256x256xf32> -> vector<256x256xf32>
    %c0_9 = arith.constant 0 : index
    %c0_10 = arith.constant 0 : index
    %12 = vector.load %arg5[%c0_9, %c0_10] : memref<256x1xf32, #tpu.memory_space<vmem>>, vector<256x1xf32>
    %13 = vector.broadcast %12 : vector<256x1xf32> to vector<256x256xf32>
    %14 = arith.addf %11, %13 : vector<256x256xf32>
    %cst_11 = arith.constant 0.000000e+00 : f32
    %15 = vector.broadcast %cst_11 : f32 to vector<256x256xf32>
    %16 = arith.maximumf %14, %15 : vector<256x256xf32>
    %17 = arith.truncf %16 : vector<256x256xf32> to vector<256x256xbf16>
    %c0_12 = arith.constant 0 : index
    %c0_13 = arith.constant 0 : index
    %18 = vector.load %arg6[%c0_12, %c0_13] : memref<128x256xbf16, #tpu.memory_space<vmem>>, vector<128x256xbf16>
    %cst_14 = arith.constant dense<0.000000e+00> : vector<128x256xf32>
    %19 = tpu.matmul %18, %17, %cst_14 {dimension_numbers = #tpu.dot_dimension_numbers<[1], [0], [0], [1], [0, 0, 1, 1], [], []>} : vector<128x256xbf16>, vector<256x256xbf16>, vector<128x256xf32> -> vector<128x256xf32>
    %c0_15 = arith.constant 0 : index
    %c0_16 = arith.constant 0 : index
    %20 = vector.load %arg7[%c0_15, %c0_16] : memref<128x1xf32, #tpu.memory_space<vmem>>, vector<128x1xf32>
    %21 = vector.broadcast %20 : vector<128x1xf32> to vector<128x256xf32>
    %22 = arith.addf %19, %21 : vector<128x256xf32>
    %cst_17 = arith.constant 0.000000e+00 : f32
    %23 = vector.broadcast %cst_17 : f32 to vector<128x256xf32>
    %24 = arith.maximumf %22, %23 : vector<128x256xf32>
    %c0_18 = arith.constant 0 : index
    %c0_19 = arith.constant 0 : index
    %25 = vector.load %arg8[%c0_18, %c0_19] : memref<128x1xf32, #tpu.memory_space<vmem>>, vector<128x1xf32>
    %26 = vector.broadcast %25 : vector<128x1xf32> to vector<128x256xf32>
    %27 = arith.mulf %24, %26 : vector<128x256xf32>
    %cst_20 = arith.constant dense<0.000000e+00> : vector<256xf32>
    %28 = vector.multi_reduction <add>, %27, %cst_20 [0] : vector<128x256xf32> to vector<256xf32>
    %29 = vector.shape_cast %28 : vector<256xf32> to vector<1x256xf32>
    %c0_21 = arith.constant 0 : index
    %c0_22 = arith.constant 0 : index
    %30 = vector.load %arg9[%c0_21, %c0_22] : memref<1x1xf32, #tpu.memory_space<vmem>>, vector<1x1xf32>
    %31 = vector.broadcast %30 : vector<1x1xf32> to vector<1x256xf32>
    %32 = arith.addf %29, %31 : vector<1x256xf32>
    %c0_23 = arith.constant 0 : index
    %c0_24 = arith.constant 0 : index
    %33 = vector.load %arg10[%c0_23, %c0_24] : memref<1x256xf32, #tpu.memory_space<vmem>>, vector<1x256xf32>
    tpu.vector_store %arg10[%c0_23, %c0_24], %32 {strides = array<i32>} : memref<1x256xf32, #tpu.memory_space<vmem>>, vector<1x256xf32>,
    return
  }
  func.func @transform_0(%arg0: i32) -> (i32, i32) {
    %c0_i32 = arith.constant 0 : i32
    %c0_i32_0 = arith.constant 0 : i32
    return %arg0, %c0_i32 : i32, i32
  }
  func.func @transform_1(%arg0: i32) -> (i32, i32) {
    %c0_i32 = arith.constant 0 : i32
    %c0_i32_0 = arith.constant 0 : i32
    %c0_i32_1 = arith.constant 0 : i32
    return %c0_i32, %c0_i32_0 : i32, i32
  }
  func.func @transform_2(%arg0: i32) -> (i32, i32) {
    %c0_i32 = arith.constant 0 : i32
    %c0_i32_0 = arith.constant 0 : i32
    %c0_i32_1 = arith.constant 0 : i32
    return %c0_i32, %c0_i32_0 : i32, i32
  }
  func.func @transform_3(%arg0: i32) -> (i32, i32) {
    %c0_i32 = arith.constant 0 : i32
    %c0_i32_0 = arith.constant 0 : i32
    %c0_i32_1 = arith.constant 0 : i32
    return %c0_i32, %c0_i32_0 : i32, i32
  }
  func.func @transform_4(%arg0: i32) -> (i32, i32) {
    %c0_i32 = arith.constant 0 : i32
    %c0_i32_0 = arith.constant 0 : i32
    %c0_i32_1 = arith.constant 0 : i32
    return %c0_i32, %c0_i32_0 : i32, i32
  }
  func.func @transform_5(%arg0: i32) -> (i32, i32) {
    %c0_i32 = arith.constant 0 : i32
    %c0_i32_0 = arith.constant 0 : i32
    %c0_i32_1 = arith.constant 0 : i32
    return %c0_i32, %c0_i32_0 : i32, i32
  }
  func.func @transform_6(%arg0: i32) -> (i32, i32) {
    %c0_i32 = arith.constant 0 : i32
    %c0_i32_0 = arith.constant 0 : i32
    %c0_i32_1 = arith.constant 0 : i32
    return %c0_i32, %c0_i32_0 : i32, i32
  }
  func.func @transform_7(%arg0: i32) -> (i32, i32) {
    %c0_i32 = arith.constant 0 : i32
    %c0_i32_0 = arith.constant 0 : i32
    %c0_i32_1 = arith.constant 0 : i32
    return %c0_i32, %c0_i32_0 : i32, i32
  }
  func.func @transform_8(%arg0: i32) -> (i32, i32) {
    %c0_i32 = arith.constant 0 : i32
    %c0_i32_0 = arith.constant 0 : i32
    %c0_i32_1 = arith.constant 0 : i32
    return %c0_i32, %c0_i32_0 : i32, i32
  }
  func.func @transform_9(%arg0: i32) -> (i32, i32) {
    %c0_i32 = arith.constant 0 : i32
    %c0_i32_0 = arith.constant 0 : i32
    return %c0_i32, %arg0 : i32, i32
  }
}

</mosaic_0001>

<bundles_post_ra>
// kernel: value_network_forward.1
= control target key start
LH: loop header
LB: loop body
LE: loop exit
PB: predicated region body
PF: predicated region fallthrough
CT: control target
= control target key end

     0   :  { %s2681_s11 = smov 0   ;;  %s3742_s0 = inlined_call_operand.vmem [shape: f32[512,48], index: 0, kind: input, shape index: {}]   ;;  %s3743_s1 = inlined_call_operand.vmem [shape: bf16[256,48], index: 1, kind: input, shape index: {}]   ;;  %s3744_s2 = inlined_call_operand.vmem [shape: f32[256,1], index: 2, kind: input, shape index: {}]   ;;  %s3745_s3 = inlined_call_operand.vmem [shape: bf16[256,256], index: 3, kind: input, shape index: {}]   ;;  %s3746_s4 = inlined_call_operand.vmem [shape: f32[256,1], index: 4, kind: input, shape index: {}]   ;;  %s3747_s5 = inlined_call_operand.vmem [shape: bf16[128,256], index: 5, kind: input, shape index: {}]   ;;  %s3748_s6 = inlined_call_operand.vmem [shape: f32[128,1], index: 6, kind: input, shape index: {}]   ;;  %s3749_s7 = inlined_call_operand.vmem [shape: f32[128,1], index: 7, kind: input, shape index: {}]   ;;  %s3750_s8 = inlined_call_operand.<no memory space> [shape: f32[1,1], index: 8, kind: input, shape index: {}]   ;;  %s3751_s9 = inlined_call_operand.vmem [shape: f32[1,512], index: 9, kind: output, shape index: {}]  }
   0x1   :  { %v14_v0 = vstv %s3750_s8 }
   0x2   :  { %15 = vst [vmem:[#allocation2] sm:$0x1] %v14_v0 }
   0x3 LB: > { %s2340_s12 = sadd.s32 4294967295, %s2624_s11   ;;  %p2344_p0 = scmp.ge.s32.totalorder %s2624_s11, 1  ;;  %s2624_s11 = sphi %s2681_s11, %s21_s11  }
   0x4   : > { %p290_p1 = scmp.lt.s32.totalorder %s2624_s11, 3 }
   0x6   : > { %p291_p2 = pnand %p2344_p0, %p290_p1 }
   0x8   : > { %294 = sbr.rel (%p291_p2) target bundleno = 1069 (0x42d), region = 56 }
   0xd   : > { %s2345_s13 = sshll.u32 %s2340_s12, 5  ;;  %v431_v1 = vld [vmem:[%s3744_s2 + $0x70] sm:$0xff]  ;;  %v429_v2 = vld [vmem:[%s3744_s2 + $0x60] sm:$0xff]  ;;  %v2626_v3 = vmov 0   ;;  %v432_v4 = vld [vmem:[%s3744_s2 + $0x78] sm:$0xff]  ;;  %vm689_vm0 = vcmask 392192  }
   0xe   : > { %p326_p3 = scmp.lt.s32.totalorder %s2345_s13, 63  ;;  %2528 = vset.pattern.permute.xlu0 %v2626_v3  ;;  %2529 = vset.pattern.permute.xlu1 %v2626_v3  ;;  %v430_v5 = vld [vmem:[%s3744_s2 + $0x68] sm:$0xff]  ;;  %v427_v6 = vld [vmem:[%s3744_s2 + $0x50] sm:$0xff]  ;;  %v428_v7 = vld [vmem:[%s3744_s2 + $0x58] sm:$0xff]  ;;  %s2347_s19 = sshll.u32 %s2340_s12, 1 }
   0xf   : > { %521 = vperm.xlu0 %2528, %v431_v1   ;;  %511 = vperm.xlu1 %2529, %v429_v2   ;;  %v2717_v8 = vld [vmem:[%s3743_s1] sm:$0xff]   ;;  %v426_v22 = vld [vmem:[%s3744_s2 + $0x48] sm:$0xff]  ;;  %v423_v26 = vld [vmem:[%s3744_s2 + $0x30] sm:$0xff]  ;;  %p332_p4 = scmp.lt.s32.totalorder %s2347_s19, 3 }
  0x10   : > { %s3789_s13 = smov (!%p326_p3, %s2345_s13), 63  ;;  %2446 = vmatprep.mubr.msk.bf16.mxu0 %vm689_vm0, %v2717_v8  ;;  %v425_v21 = vld [vmem:[%s3744_s2 + $0x40] sm:$0xff]  ;;  %v424_v27 = vld [vmem:[%s3744_s2 + $0x38] sm:$0xff]  ;;  %v422_v33 = vld [vmem:[%s3744_s2 + $0x28] sm:$0xff] }
  0x11   : > { %s2346_s21 = sshll.u32 %s3789_s13, 3  ;;  %v421_v32 = vld [vmem:[%s3744_s2 + $0x20] sm:$0xff]  ;;  %v419_v37 = vld [vmem:[%s3744_s2 + $0x10] sm:$0xff]  ;;  %v420_v38 = vld [vmem:[%s3744_s2 + $0x18] sm:$0xff]  ;;  %s3791_s19 = smov (!%p332_p4, %s2347_s19), 3 }
  0x12   : > { %s2706_s24 = scalar_lea.vmem %s3742_s0, %s2346_s21  ;;  %v417_v43 = vld [vmem:[%s3744_s2] sm:$0xff]  ;;  %v418_v44 = vld [vmem:[%s3744_s2 + $0x8] sm:$0xff]  ;;  %v447_v48 = vld [vmem:[%s3744_s2 + $0xf0] sm:$0xff]  ;;  %s334_s22 = scalar_lea.vmem %s3751_s9, %s3791_s19 }
  0x13   : > { %526 = vperm.xlu0 %2528, %v432_v4   ;;  %516 = vperm.xlu1 %2529, %v430_v5   ;;  %v367_v9 = vld [vmem:[%s2706_s24 + $0xf0] sm:$0xff]  ;;  %v368_v10 = vld [vmem:[%s2706_s24 + $0xf8] sm:$0xff]  ;;  %v365_v14 = vld [vmem:[%s2706_s24 + $0xe0] sm:$0xff] }
  0x14   : > { %v351_v11 = vld [vmem:[%s2706_s24 + $0x70] sm:$0xff]  ;;  %v384_v12 = vpack.c.bf16 %v368_v10, %v367_v9  ;;  %v352_v13 = vld [vmem:[%s2706_s24 + $0x78] sm:$0xff]  ;;  %v366_v15 = vld [vmem:[%s2706_s24 + $0xe8] sm:$0xff] }
  0x15   : > { %v376_v16 = vpack.c.bf16 %v352_v13, %v351_v11  ;;  %v383_v17 = vpack.c.bf16 %v366_v15, %v365_v14  ;;  %v349_v18 = vld [vmem:[%s2706_s24 + $0x60] sm:$0xff]  ;;  %v350_v19 = vld [vmem:[%s2706_s24 + $0x68] sm:$0xff]  ;;  %v363_v24 = vld [vmem:[%s2706_s24 + $0xd0] sm:$0xff] }
  0x16   : > { %2510 = vmatprep.subr.msk.bf16.mxu0 %vm689_vm0, %v384_v12  ;;  %v375_v23 = vpack.c.bf16 %v350_v19, %v349_v18  ;;  %v364_v25 = vld [vmem:[%s2706_s24 + $0xd8] sm:$0xff]  ;;  %v347_v30 = vld [vmem:[%s2706_s24 + $0x50] sm:$0xff]  ;;  %v361_v35 = vld [vmem:[%s2706_s24 + $0xc0] sm:$0xff] }
  0x17   : > { %501 = vperm.xlu0 %2528, %v427_v6   ;;  %v760_v20 = vsel %vm689_vm0, %v376_v16, 0  ;;  %506 = vperm.xlu1 %2529, %v428_v7   ;;  %v382_v29 = vpack.c.bf16 %v364_v25, %v363_v24  ;;  %v348_v31 = vld [vmem:[%s2706_s24 + $0x58] sm:$0xff]  ;;  %v362_v36 = vld [vmem:[%s2706_s24 + $0xc8] sm:$0xff]  ;;  %v345_v41 = vld [vmem:[%s2706_s24 + $0x40] sm:$0xff] }
  0x18   : > { %2431 = vmatpush3.bf16.xpose.msra.mxu0 %v760_v20  ;;  %v757_v28 = vsel %vm689_vm0, %v375_v23, 0  ;;  %v374_v34 = vpack.c.bf16 %v348_v31, %v347_v30  ;;  %v381_v40 = vpack.c.bf16 %v362_v36, %v361_v35  ;;  %v346_v42 = vld [vmem:[%s2706_s24 + $0x48] sm:$0xff]  ;;  %v359_v46 = vld [vmem:[%s2706_s24 + $0xb0] sm:$0xff]  ;;  %v360_v47 = vld [vmem:[%s2706_s24 + $0xb8] sm:$0xff] }
  0x19   : > { %2511 = vmatprep.subr.msk.bf16.mxu0 %vm689_vm0, %v383_v17  ;;  %v373_v45 = vpack.c.bf16 %v346_v42, %v345_v41  ;;  %v448_v49 = vld [vmem:[%s3744_s2 + $0xf8] sm:$0xff]  ;;  %v380_v51 = vpack.c.bf16 %v360_v47, %v359_v46  ;;  %v343_v52 = vld [vmem:[%s2706_s24 + $0x30] sm:$0xff]  ;;  %v445_v54 = vld [vmem:[%s3744_s2 + $0xe0] sm:$0xff] }
  0x1a   : > { %v754_v39 = vsel %vm689_vm0, %v374_v34, 0  ;;  %v344_v53 = vld [vmem:[%s2706_s24 + $0x38] sm:$0xff]  ;;  %v446_v55 = vld [vmem:[%s3744_s2 + $0xe8] sm:$0xff]  ;;  %v357_v57 = vld [vmem:[%s2706_s24 + $0xa0] sm:$0xff] }
  0x1b   : > { %491 = vperm.xlu0 %2528, %v425_v21   ;;  %496 = vperm.xlu1 %2529, %v426_v22   ;;  %v751_v50 = vsel %vm689_vm0, %v373_v45, 0  ;;  %v372_v56 = vpack.c.bf16 %v344_v53, %v343_v52  ;;  %v358_v58 = vld [vmem:[%s2706_s24 + $0xa8] sm:$0xff]  ;;  %v443_v59 = vld [vmem:[%s3744_s2 + $0xd0] sm:$0xff]  ;;  %v444_v60 = vld [vmem:[%s3744_s2 + $0xd8] sm:$0xff] }
  0x1c   : > { %v379_v62 = vpack.c.bf16 %v358_v58, %v357_v57  ;;  %v341_v63 = vld [vmem:[%s2706_s24 + $0x20] sm:$0xff]  ;;  %v342_v0 = vld [vmem:[%s2706_s24 + $0x28] sm:$0xff]  ;;  %v355_v4 = vld [vmem:[%s2706_s24 + $0x90] sm:$0xff] }
  0x1d   : > { %v748_v61 = vsel %vm689_vm0, %v372_v56, 0  ;;  %v441_v1 = vld [vmem:[%s3744_s2 + $0xc0] sm:$0xff]  ;;  %v442_v2 = vld [vmem:[%s3744_s2 + $0xc8] sm:$0xff]  ;;  %v371_v3 = vpack.c.bf16 %v342_v0, %v341_v63  ;;  %v356_v5 = vld [vmem:[%s2706_s24 + $0x98] sm:$0xff] }
  0x1e   : > { %v439_v6 = vld [vmem:[%s3744_s2 + $0xb0] sm:$0xff]  ;;  %v440_v7 = vld [vmem:[%s3744_s2 + $0xb8] sm:$0xff]  ;;  %v378_v12 = vpack.c.bf16 %v356_v5, %v355_v4  ;;  %v437_v13 = vld [vmem:[%s3744_s2 + $0xa0] sm:$0xff] }
  0x1f   : > { %481 = vperm.xlu0 %2528, %v423_v26   ;;  %486 = vperm.xlu1 %2529, %v424_v27   ;;  %v339_v9 = vld [vmem:[%s2706_s24 + $0x10] sm:$0xff]  ;;  %v340_v10 = vld [vmem:[%s2706_s24 + $0x18] sm:$0xff]  ;;  %v745_v11 = vsel %vm689_vm0, %v371_v3, 0  ;;  %v353_v14 = vld [vmem:[%s2706_s24 + $0x80] sm:$0xff] }
  0x20   : > { %2433 = vmatpush3.bf16.xpose.msra.mxu0 %v757_v28  ;;  %v354_v15 = vld [vmem:[%s2706_s24 + $0x88] sm:$0xff]  ;;  %v370_v17 = vpack.c.bf16 %v340_v10, %v339_v9  ;;  %v435_v18 = vld [vmem:[%s3744_s2 + $0x90] sm:$0xff]  ;;  %v436_v19 = vld [vmem:[%s3744_s2 + $0x98] sm:$0xff] }
  0x21   : > { %2512 = vmatprep.subr.msk.bf16.mxu0 %vm689_vm0, %v382_v29  ;;  %v438_v16 = vld [vmem:[%s3744_s2 + $0xa8] sm:$0xff]  ;;  %v337_v20 = vld [vmem:[%s2706_s24] sm:$0xff]  ;;  %v377_v23 = vpack.c.bf16 %v354_v15, %v353_v14  ;;  %v1121_v27 = vld [vmem:[%s3746_s4 + $0x70] sm:$0xff] }
  0x22   : > { %v338_v21 = vld [vmem:[%s2706_s24 + $0x8] sm:$0xff]  ;;  %v742_v22 = vsel %vm689_vm0, %v370_v17, 0  ;;  %v433_v24 = vld [vmem:[%s3744_s2 + $0x80] sm:$0xff]  ;;  %v1122_v28 = vld [vmem:[%s3746_s4 + $0x78] sm:$0xff] }
  0x23   : > { %471 = vperm.xlu0 %2528, %v421_v32   ;;  %476 = vperm.xlu1 %2529, %v422_v33   ;;  %v434_v25 = vld [vmem:[%s3744_s2 + $0x88] sm:$0xff]  ;;  %v369_v26 = vpack.c.bf16 %v338_v21, %v337_v20  ;;  %v1119_v30 = vld [vmem:[%s3746_s4 + $0x60] sm:$0xff]  ;;  %v1117_v32 = vld [vmem:[%s3746_s4 + $0x50] sm:$0xff] }
  0x24   : > { %v1120_v31 = vld [vmem:[%s3746_s4 + $0x68] sm:$0xff]  ;;  %v1118_v34 = vld [vmem:[%s3746_s4 + $0x58] sm:$0xff]  ;;  %v1115_v35 = vld [vmem:[%s3746_s4 + $0x40] sm:$0xff] }
  0x25   : > { %v739_v29 = vsel %vm689_vm0, %v369_v26, 0  ;;  %v2531_v33 = vld [vmem:[%s3743_s1 + $0x8] sm:$0xff]   ;;  %v1109_v41 = vld [vmem:[%s3746_s4 + $0x10] sm:$0xff]  ;;  %v2533_v42 = vld [vmem:[%s3743_s1 + $0x18] sm:$0xff]  }
  0x26   : > { %v1116_v36 = vld [vmem:[%s3746_s4 + $0x48] sm:$0xff]  ;;  %v1137_v46 = vld [vmem:[%s3746_s4 + $0xf0] sm:$0xff]  ;;  %v2534_v47 = vld [vmem:[%s3743_s1 + $0x20] sm:$0xff]  }
  0x27   : > { %461 = vperm.xlu0 %2528, %v419_v37   ;;  %466 = vperm.xlu1 %2529, %v420_v38   ;;  %v1113_v37 = vld [vmem:[%s3746_s4 + $0x30] sm:$0xff]  ;;  %v1114_v38 = vld [vmem:[%s3746_s4 + $0x38] sm:$0xff]  ;;  %v1108_v45 = vld [vmem:[%s3746_s4 + $0x8] sm:$0xff] }
  0x28   : > { %2435 = vmatpush3.bf16.xpose.msra.mxu0 %v754_v39  ;;  %v1111_v39 = vld [vmem:[%s3746_s4 + $0x20] sm:$0xff]  ;;  %v2535_v52 = vld [vmem:[%s3743_s1 + $0x28] sm:$0xff]   ;;  %v1134_v53 = vld [vmem:[%s3746_s4 + $0xd8] sm:$0xff] }
  0x29   : > { %2513 = vmatprep.subr.msk.bf16.mxu0 %vm689_vm0, %v381_v40  ;;  %v1112_v40 = vld [vmem:[%s3746_s4 + $0x28] sm:$0xff]  ;;  %v1129_v56 = vld [vmem:[%s3746_s4 + $0xb0] sm:$0xff]  ;;  %v1130_v58 = vld [vmem:[%s3746_s4 + $0xb8] sm:$0xff] }
  0x2a   : > { %v2536_v57 = vld [vmem:[%s3743_s1 + $0x30] sm:$0xff]   ;;  %v1126_v63 = vld [vmem:[%s3746_s4 + $0x98] sm:$0xff]  ;;  %v1123_v0 = vld [vmem:[%s3746_s4 + $0x80] sm:$0xff] }
  0x2b   : > { %451 = vperm.xlu0 %2528, %v417_v43   ;;  %456 = vperm.xlu1 %2529, %v418_v44   ;;  %v1110_v43 = vld [vmem:[%s3746_s4 + $0x18] sm:$0xff]  ;;  %v1107_v44 = vld [vmem:[%s3746_s4] sm:$0xff]  ;;  %v1765_v4 = vld [vmem:[%s3748_s6 + $0x8] sm:$0xff] }
  0x2c   : > { %v2538_v3 = vld [vmem:[%s3743_s1 + $0x40] sm:$0xff]   ;;  %v1766_v5 = vld [vmem:[%s3748_s6 + $0x10] sm:$0xff]  ;;  %v2539_v9 = vld [vmem:[%s3743_s1 + $0x48] sm:$0xff]  }
  0x2d   : > { %v2085_v10 = vld [vmem:[%s3749_s7] sm:$0xff]  ;;  %v2540_v14 = vld [vmem:[%s3743_s1 + $0x50] sm:$0xff]   ;;  %v2088_v15 = vld [vmem:[%s3749_s7 + $0x18] sm:$0xff] }
  0x2e   : > { %v2089_v17 = vld [vmem:[%s3749_s7 + $0x20] sm:$0xff]  ;;  %v2090_v20 = vld [vmem:[%s3749_s7 + $0x28] sm:$0xff]  ;;  %v1774_v26 = vld [vmem:[%s3748_s6 + $0x50] sm:$0xff] }
  0x2f   : > { %601 = vperm.xlu0 %2528, %v447_v48   ;;  %606 = vperm.xlu1 %2529, %v448_v49   ;;  %v1138_v48 = vld [vmem:[%s3746_s4 + $0xf8] sm:$0xff]  ;;  %v1135_v49 = vld [vmem:[%s3746_s4 + $0xe0] sm:$0xff] }
  0x30   : > { %2437 = vmatpush3.bf16.xpose.msra.mxu0 %v751_v50  ;;  %v1136_v50 = vld [vmem:[%s3746_s4 + $0xe8] sm:$0xff]  ;;  %v1772_v21 = vld [vmem:[%s3748_s6 + $0x40] sm:$0xff] }
  0x31   : > { %2514 = vmatprep.subr.msk.bf16.mxu0 %vm689_vm0, %v380_v51  ;;  %v1133_v51 = vld [vmem:[%s3746_s4 + $0xd0] sm:$0xff] }
  0x33   : > { %591 = vperm.xlu0 %2528, %v445_v54   ;;  %596 = vperm.xlu1 %2529, %v446_v55   ;;  %v1131_v54 = vld [vmem:[%s3746_s4 + $0xc0] sm:$0xff]  ;;  %v1132_v55 = vld [vmem:[%s3746_s4 + $0xc8] sm:$0xff] }
  0x37   : > { %581 = vperm.xlu0 %2528, %v443_v59   ;;  %586 = vperm.xlu1 %2529, %v444_v60   ;;  %v1127_v59 = vld [vmem:[%s3746_s4 + $0xa0] sm:$0xff]  ;;  %v1128_v60 = vld [vmem:[%s3746_s4 + $0xa8] sm:$0xff] }
  0x38   : > { %2439 = vmatpush3.bf16.xpose.msra.mxu0 %v748_v61  ;;  %v1125_v61 = vld [vmem:[%s3746_s4 + $0x90] sm:$0xff] }
  0x39   : > { %2515 = vmatprep.subr.msk.bf16.mxu0 %vm689_vm0, %v379_v62  ;;  %v2537_v62 = vld [vmem:[%s3743_s1 + $0x38] sm:$0xff]  }
  0x3b   : > { %571 = vperm.xlu0 %2528, %v441_v1   ;;  %576 = vperm.xlu1 %2529, %v442_v2   ;;  %v1124_v1 = vld [vmem:[%s3746_s4 + $0x88] sm:$0xff]  ;;  %v1764_v2 = vld [vmem:[%s3748_s6] sm:$0xff] }
  0x3f   : > { %561 = vperm.xlu0 %2528, %v439_v6   ;;  %566 = vperm.xlu1 %2529, %v440_v7   ;;  %v1767_v6 = vld [vmem:[%s3748_s6 + $0x18] sm:$0xff]  ;;  %v1768_v7 = vld [vmem:[%s3748_s6 + $0x20] sm:$0xff] }
  0x40   : > { %2441 = vmatpush3.bf16.xpose.msra.mxu0 %v745_v11  ;;  %v2086_v11 = vld [vmem:[%s3749_s7 + $0x8] sm:$0xff] }
  0x41   : > { %2516 = vmatprep.subr.msk.bf16.mxu0 %vm689_vm0, %v378_v12  ;;  %v2087_v12 = vld [vmem:[%s3749_s7 + $0x10] sm:$0xff] }
  0x43   : > { %551 = vperm.xlu0 %2528, %v437_v13   ;;  %556 = vperm.xlu1 %2529, %v438_v16   ;;  %v1769_v13 = vld [vmem:[%s3748_s6 + $0x28] sm:$0xff]  ;;  %v1770_v16 = vld [vmem:[%s3748_s6 + $0x30] sm:$0xff] }
  0x47   : > { %541 = vperm.xlu0 %2528, %v435_v18   ;;  %546 = vperm.xlu1 %2529, %v436_v19   ;;  %v1771_v18 = vld [vmem:[%s3748_s6 + $0x38] sm:$0xff] }
  0x48   : > { %2443 = vmatpush3.bf16.xpose.msra.mxu0 %v742_v22  ;;  %v2541_v19 = vld [vmem:[%s3743_s1 + $0x58] sm:$0xff]   ;;  %v2091_v22 = vld [vmem:[%s3749_s7 + $0x30] sm:$0xff] }
  0x49   : > { %2517 = vmatprep.subr.msk.bf16.mxu0 %vm689_vm0, %v377_v23  ;;  %v1773_v23 = vld [vmem:[%s3748_s6 + $0x48] sm:$0xff] }
  0x4b   : > { %531 = vperm.xlu0 %2528, %v433_v24   ;;  %536 = vperm.xlu1 %2529, %v434_v25   ;;  %v2542_v24 = vld [vmem:[%s3743_s1 + $0x60] sm:$0xff]   ;;  %v2092_v25 = vld [vmem:[%s3749_s7 + $0x38] sm:$0xff] }
  0x4f   : > { %1211 = vperm.xlu0 %2528, %v1121_v27   ;;  %1216 = vperm.xlu1 %2529, %v1122_v28   ;;  %v2093_v27 = vld [vmem:[%s3749_s7 + $0x40] sm:$0xff]  ;;  %v1775_v28 = vld [vmem:[%s3748_s6 + $0x58] sm:$0xff] }
  0x50   : > { %2445 = vmatpush3.bf16.xpose.msra.mxu0 %v739_v29  ;;  %v2543_v29 = vld [vmem:[%s3743_s1 + $0x68] sm:$0xff]  }
  0x53   : > { %1201 = vperm.xlu0 %2528, %v1119_v30   ;;  %1206 = vperm.xlu1 %2529, %v1120_v31   ;;  %v2094_v30 = vld [vmem:[%s3749_s7 + $0x48] sm:$0xff]  ;;  %v1776_v31 = vld [vmem:[%s3748_s6 + $0x60] sm:$0xff] }
  0x57   : > { %1191 = vperm.xlu0 %2528, %v1117_v32   ;;  %2447 = vmatmul.mubr.msk.bf16.vlgmr.msra.gmra.mxu0 %vm689_vm0, %v2717_v8  ;;  %v2532_v8 = vld [vmem:[%s3743_s1 + $0x10] sm:$0xff]  }
  0x58   : > { %1196 = vperm.xlu1 %2529, %v1118_v34   ;;  %2448 = vmatprep.mubr.msk.bf16.mxu0 %vm689_vm0, %v2531_v33  ;;  %v2095_v32 = vld [vmem:[%s3749_s7 + $0x50] sm:$0xff] }
  0x59   : > { %v2544_v34 = vld [vmem:[%s3743_s1 + $0x70] sm:$0xff]  }
  0x5b   : > { %1181 = vperm.xlu0 %2528, %v1115_v35   ;;  %v2096_v35 = vld [vmem:[%s3749_s7 + $0x58] sm:$0xff] }
  0x5c   : > { %1186 = vperm.xlu1 %2529, %v1116_v36   ;;  %v1778_v36 = vld [vmem:[%s3748_s6 + $0x70] sm:$0xff] }
  0x5f   : > { %1171 = vperm.xlu0 %2528, %v1113_v37   ;;  %2449 = vmatmul.mubr.msk.bf16.gmra.mxu0 %vm689_vm0, %v2531_v33  ;;  %v1777_v33 = vld [vmem:[%s3748_s6 + $0x68] sm:$0xff]  ;;  %v2097_v37 = vld [vmem:[%s3749_s7 + $0x60] sm:$0xff] }
  0x60   : > { %1176 = vperm.xlu1 %2529, %v1114_v38   ;;  %2450 = vmatprep.mubr.msk.bf16.mxu0 %vm689_vm0, %v2532_v8  ;;  %v2545_v38 = vld [vmem:[%s3743_s1 + $0x78] sm:$0xff]  }
  0x63   : > { %1161 = vperm.xlu0 %2528, %v1111_v39   ;;  %v2098_v39 = vld [vmem:[%s3749_s7 + $0x68] sm:$0xff] }
  0x64   : > { %1166 = vperm.xlu1 %2529, %v1112_v40   ;;  %v2099_v40 = vld [vmem:[%s3749_s7 + $0x70] sm:$0xff] }
  0x67   : > { %1151 = vperm.xlu0 %2528, %v1109_v41   ;;  %2451 = vmatmul.mubr.msk.bf16.gmra.mxu0 %vm689_vm0, %v2532_v8  ;;  %v1779_v8 = vld [vmem:[%s3748_s6 + $0x78] sm:$0xff] }
  0x68   : > { %1156 = vperm.xlu1 %2529, %v1110_v43   ;;  %2452 = vmatprep.mubr.msk.bf16.mxu0 %vm689_vm0, %v2533_v42  ;;  %v2100_v41 = vld [vmem:[%s3749_s7 + $0x78] sm:$0xff] }
  0x6b   : > { %1141 = vperm.xlu0 %2528, %v1107_v44  }
  0x6c   : > { %1146 = vperm.xlu1 %2529, %v1108_v45  }
  0x6f   : > { %1291 = vperm.xlu0 %2528, %v1137_v46   ;;  %2453 = vmatmul.mubr.msk.bf16.gmra.mxu0 %vm689_vm0, %v2533_v42  ;;  %v2255_v42 = vld [vmem:[#allocation2] sm:$0x1] }
  0x70   : > { %1296 = vperm.xlu1 %2529, %v1138_v48   ;;  %2454 = vmatprep.mubr.msk.bf16.mxu0 %vm689_vm0, %v2534_v47 }
  0x73   : > { %1281 = vperm.xlu0 %2528, %v1135_v49  }
  0x74   : > { %1286 = vperm.xlu1 %2529, %v1136_v50  }
  0x77   : > { %1271 = vperm.xlu0 %2528, %v1133_v51   ;;  %2455 = vmatmul.mubr.msk.bf16.gmra.mxu0 %vm689_vm0, %v2534_v47 }
  0x78   : > { %1276 = vperm.xlu1 %2529, %v1134_v53   ;;  %2456 = vmatprep.mubr.msk.bf16.mxu0 %vm689_vm0, %v2535_v52 }
  0x7b   : > { %1261 = vperm.xlu0 %2528, %v1131_v54  }
  0x7c   : > { %1266 = vperm.xlu1 %2529, %v1132_v55  }
  0x7f   : > { %1251 = vperm.xlu0 %2528, %v1129_v56   ;;  %2457 = vmatmul.mubr.msk.bf16.gmra.mxu0 %vm689_vm0, %v2535_v52 }
  0x80   : > { %1256 = vperm.xlu1 %2529, %v1130_v58   ;;  %2458 = vmatprep.mubr.msk.bf16.mxu0 %vm689_vm0, %v2536_v57 }
  0x83   : > { %1241 = vperm.xlu0 %2528, %v1127_v59  }
  0x84   : > { %1246 = vperm.xlu1 %2529, %v1128_v60  }
  0x87   : > { %1231 = vperm.xlu0 %2528, %v1125_v61   ;;  %2459 = vmatmul.mubr.msk.bf16.gmra.mxu0 %vm689_vm0, %v2536_v57 }
  0x88   : > { %1236 = vperm.xlu1 %2529, %v1126_v63   ;;  %2460 = vmatprep.mubr.msk.bf16.mxu0 %vm689_vm0, %v2537_v62 }
  0x8a   : > { %v3116_v43 = vpop.permute.xlu0 %521  ;;  %v3118_v44 = vpop.permute.xlu1 %511 }
  0x8b   : > { %1221 = vperm.xlu0 %2528, %v1123_v0  }
  0x8c   : > { %1226 = vperm.xlu1 %2529, %v1124_v1  }
  0x8e   : > { %v3120_v45 = vpop.permute.xlu0 %526  ;;  %v3122_v46 = vpop.permute.xlu1 %516 }
  0x8f   : > { %1782 = vperm.xlu0 %2528, %v1764_v2   ;;  %2461 = vmatmul.mubr.msk.bf16.gmra.mxu0 %vm689_vm0, %v2537_v62 }
  0x90   : > { %1787 = vperm.xlu1 %2529, %v1765_v4   ;;  %2462 = vmatprep.mubr.msk.bf16.mxu0 %vm689_vm0, %v2538_v3 }
  0x92   : > { %v3124_v47 = vpop.permute.xlu0 %501  ;;  %v3126_v48 = vpop.permute.xlu1 %506 }
  0x93   : > { %1792 = vperm.xlu0 %2528, %v1766_v5  }
  0x94   : > { %1797 = vperm.xlu1 %2529, %v1767_v6  }
  0x96   : > { %v3128_v49 = vpop.permute.xlu0 %491  ;;  %v3130_v50 = vpop.permute.xlu1 %496 }
  0x97   : > { %1802 = vperm.xlu0 %2528, %v1768_v7   ;;  %2463 = vmatmul.mubr.msk.bf16.gmra.mxu0 %vm689_vm0, %v2538_v3 }
  0x98   : > { %2103 = vperm.xlu1 %2529, %v2085_v10   ;;  %2464 = vmatprep.mubr.msk.bf16.mxu0 %vm689_vm0, %v2539_v9 }
  0x9a   : > { %v3132_v51 = vpop.permute.xlu0 %481  ;;  %v3134_v52 = vpop.permute.xlu1 %486 }
  0x9b   : > { %2108 = vperm.xlu0 %2528, %v2086_v11  }
  0x9c   : > { %2113 = vperm.xlu1 %2529, %v2087_v12  }
  0x9e   : > { %v3136_v53 = vpop.permute.xlu0 %471  ;;  %v3138_v54 = vpop.permute.xlu1 %476 }
  0x9f   : > { %1807 = vperm.xlu0 %2528, %v1769_v13   ;;  %2465 = vmatmul.mubr.msk.bf16.gmra.mxu0 %vm689_vm0, %v2539_v9 }
  0xa0   : > { %2118 = vperm.xlu1 %2529, %v2088_v15   ;;  %2466 = vmatprep.mubr.msk.bf16.mxu0 %vm689_vm0, %v2540_v14 }
  0xa2   : > { %v462_v55 = vpop.permute.xlu0 %461  ;;  %v467_v56 = vpop.permute.xlu1 %466 }
  0xa3   : > { %1812 = vperm.xlu0 %2528, %v1770_v16  }
  0xa4   : > { %2123 = vperm.xlu1 %2529, %v2089_v17  }
  0xa6   : > { %v452_v58 = vpop.permute.xlu0 %451  ;;  %v457_v61 = vpop.permute.xlu1 %456 }
  0xa7   : > { %1817 = vperm.xlu0 %2528, %v1771_v18   ;;  %2467 = vmatmul.mubr.msk.bf16.gmra.mxu0 %vm689_vm0, %v2540_v14 }
  0xa8   : > { %2128 = vperm.xlu1 %2529, %v2090_v20   ;;  %2468 = vmatprep.mubr.msk.bf16.mxu0 %vm689_vm0, %v2541_v19 }
  0xab   : > { %1822 = vperm.xlu0 %2528, %v1772_v21  }
  0xac   : > { %2133 = vperm.xlu1 %2529, %v2091_v22  }
  0xaf   : > { %1827 = vperm.xlu0 %2528, %v1773_v23   ;;  %2469 = vmatmul.mubr.msk.bf16.gmra.mxu0 %vm689_vm0, %v2541_v19 }
  0xb0   : > { %2138 = vperm.xlu1 %2529, %v2092_v25   ;;  %2470 = vmatprep.mubr.msk.bf16.mxu0 %vm689_vm0, %v2542_v24 }
  0xb3   : > { %1832 = vperm.xlu0 %2528, %v1774_v26  }
  0xb4   : > { %2143 = vperm.xlu1 %2529, %v2093_v27  }
  0xb7   : > { %1837 = vperm.xlu0 %2528, %v1775_v28   ;;  %2471 = vmatmul.mubr.msk.bf16.gmra.mxu0 %vm689_vm0, %v2542_v24  ;;  %v3156_v28 = vpop.permute.xlu0 %601 }
  0xb8   : > { %2148 = vperm.xlu1 %2529, %v2094_v30   ;;  %2472 = vmatprep.mubr.msk.bf16.mxu0 %vm689_vm0, %v2543_v29  ;;  %v3160_v30 = vpop.permute.xlu1 %606 }
  0xbb   : > { %1842 = vperm.xlu0 %2528, %v1776_v31  }
  0xbc   : > { %2153 = vperm.xlu1 %2529, %v2095_v32  }
  0xbf   : > { %1847 = vperm.xlu0 %2528, %v1777_v33   ;;  %2473 = vmatmul.mubr.msk.bf16.gmra.mxu0 %vm689_vm0, %v2543_v29  ;;  %v3166_v33 = vpop.permute.xlu0 %591 }
  0xc0   : > { %2158 = vperm.xlu1 %2529, %v2096_v35   ;;  %2474 = vmatprep.mubr.msk.bf16.mxu0 %vm689_vm0, %v2544_v34  ;;  %v3168_v35 = vpop.permute.xlu1 %596 }
  0xc3   : > { %1852 = vperm.xlu0 %2528, %v1778_v36  }
  0xc4   : > { %2163 = vperm.xlu1 %2529, %v2097_v37  }
  0xc7   : > { %1857 = vperm.xlu0 %2528, %v1779_v8   ;;  %2475 = vmatmul.mubr.msk.bf16.gmra.mxu0 %vm689_vm0, %v2544_v34  ;;  %v2548_v8 = vld [vmem:[%s3745_s3 + $0x4] ss:$8 sps:$4 sm:$0xff]  }
  0xc8   : > { %2168 = vperm.xlu1 %2529, %v2098_v39   ;;  %2476 = vmatprep.mubr.msk.bf16.mxu0 %vm689_vm0, %v2545_v38 }
  0xc9   : > { %1491 = vmatprep.mubr.bf16.mxu1 %v2548_v8 }
  0xcb   : > { %2173 = vperm.xlu0 %2528, %v2099_v40   ;;  %v3179_v40 = vpop.permute.xlu1 %586 }
  0xcc   : > { %2178 = vperm.xlu1 %2529, %v2100_v41  }
  0xcf   : > { %2258 = vperm.xlu0 %2528, %v2255_v42   ;;  %2477 = vmatmul.mubr.msk.bf16.gmra.mxu0 %vm689_vm0, %v2545_v38  ;;  %v3175_v38 = vpop.permute.xlu0 %581 }
 0x117   : > { %v820_v57 = vpop.f32.mrf.mxu0 }
 0x118   : > { %v821_v60 = vadd.f32 %v820_v57, %v452_v58  ;;  %v3183_v57 = vpop.permute.xlu1 %576 }
 0x119   : > { %v822_v59 = vpop.f32.mrf.mxu0  ;;  %3765 = vst [vmem:[#allocation4_spill] sm:$0xff] %v3183_v57 }
 0x11a   : > { %v823_v63 = vadd.f32 %v822_v59, %v452_v58  ;;  %v979_v2 = vmax.f32 %v821_v60, 0.0 }
 0x11b   : > { %v824_v62 = vpop.f32.mrf.mxu0 }
 0x11c   : > { %v825_v0 = vadd.f32 %v824_v62, %v457_v61  ;;  %v980_v6 = vmax.f32 %v823_v63, 0.0  ;;  %v3187_v62 = vpop.permute.xlu1 %566 }
 0x11d   : > { %v826_v1 = vpop.f32.mrf.mxu0  ;;  %3767 = vst [vmem:[#allocation6_spill] sm:$0xff] %v3187_v62 }
 0x11e   : > { %v981_v3 = vmax.f32 %v825_v0, 0.0  ;;  %v827_v4 = vadd.f32 %v826_v1, %v457_v61 }
 0x11f   : > { %v830_v5 = vpop.f32.mrf.mxu0 }
 0x120   : > { %v3140_v7 = vpack.c.bf16 %v981_v3, %v979_v2  ;;  %v982_v9 = vmax.f32 %v827_v4, 0.0  ;;  %v831_v12 = vadd.f32 %v830_v5, %v462_v55  ;;  %v3191_v3 = vpop.permute.xlu1 %556 }
 0x121   : > { %v832_v10 = vpop.f32.mrf.mxu0  ;;  %3769 = vst [vmem:[#allocation8_spill] sm:$0xff] %v3191_v3 }
 0x122   : > { %v3142_v11 = vpack.c.bf16 %v982_v9, %v980_v6  ;;  %v833_v14 = vadd.f32 %v832_v10, %v462_v55  ;;  %v983_v17 = vmax.f32 %v831_v12, 0.0  ;;  %v3181_v55 = vpop.permute.xlu0 %571 }
 0x123   : > { %v834_v13 = vpop.f32.mrf.mxu0  ;;  %3764 = vst [vmem:[#allocation3_spill] sm:$0xff] %v3181_v55 }
 0x124   : > { %v835_v15 = vadd.f32 %v834_v13, %v467_v56  ;;  %v984_v21 = vmax.f32 %v833_v14, 0.0  ;;  %v3198_v14 = vpop.permute.xlu1 %546 }
 0x125   : > { %v836_v16 = vpop.f32.mrf.mxu0 }
 0x126   : > { %v985_v18 = vmax.f32 %v835_v15, 0.0  ;;  %v837_v19 = vadd.f32 %v836_v16, %v467_v56  ;;  %v3185_v60 = vpop.permute.xlu0 %561 }
 0x127   : > { %v3144_v20 = vpop.f32.mrf.mxu0  ;;  %3766 = vst [vmem:[#allocation5_spill] sm:$0xff] %v3185_v60 }
 0x128   : > { %v3146_v22 = vpack.c.bf16 %v985_v18, %v983_v17  ;;  %v986_v23 = vmax.f32 %v837_v19, 0.0 }
 0x129   : > { %v3148_v24 = vpop.f32.mrf.mxu0 }
 0x12a   : > { %v3150_v25 = vpack.c.bf16 %v986_v23, %v984_v21  ;;  %v3189_v1 = vpop.permute.xlu0 %551 }
 0x12b   : > { %v3152_v26 = vpop.f32.mrf.mxu0  ;;  %3768 = vst [vmem:[#allocation7_spill] sm:$0xff] %v3189_v1 }
 0x12d   : > { %v3154_v27 = vpop.f32.mrf.mxu0 }
 0x12e   : > { %v3193_v6 = vpop.permute.xlu0 %541 }
 0x12f   : > { %v3158_v29 = vpop.f32.mrf.mxu0 }
 0x131   : > { %v3162_v31 = vpop.f32.mrf.mxu0 }
 0x132   : > { %v532_v3 = vpop.permute.xlu0 %531 }
 0x133   : > { %v3164_v32 = vpop.f32.mrf.mxu0 }
 0x135   : > { %v856_v34 = vpop.f32.mrf.mxu0 }
 0x137   : > { %v3170_v36 = vpop.f32.mrf.mxu0 }
 0x139   : > { %v862_v37 = vpop.f32.mrf.mxu0 }
 0x13b   : > { %v3177_v39 = vpop.f32.mrf.mxu0 }
 0x13d   : > { %v866_v41 = vpop.f32.mrf.mxu0 }
 0x13f   : > { %v870_v42 = vpop.f32.mrf.mxu0 }
 0x141   : > { %v872_v56 = vpop.f32.mrf.mxu0 }
 0x143   : > { %v874_v58 = vpop.f32.mrf.mxu0 }
 0x145   : > { %v876_v59 = vpop.f32.mrf.mxu0 }
 0x146   : > { %v877_v8 = vadd.f32 %v876_v59, %v3126_v48 }
 0x147   : > { %v880_v61 = vpop.f32.mrf.mxu0 }
 0x149   : > { %v882_v63 = vpop.f32.mrf.mxu0 }
 0x14a   : > { %v883_v17 = vadd.f32 %v882_v63, %v3118_v44 }
 0x14b   : > { %v884_v0 = vpop.f32.mrf.mxu0 }
 0x14c   : > { %v885_v19 = vadd.f32 %v884_v0, %v3122_v46  ;;  %v875_v0 = vadd.f32 %v874_v58, %v3126_v48 }
 0x14d   : > { %v886_v2 = vpop.f32.mrf.mxu0 }
 0x14e   : > { %v887_v10 = vadd.f32 %v886_v2, %v3122_v46  ;;  %v867_v46 = vadd.f32 %v866_v41, %v3130_v50 }
 0x14f   : > { %v890_v4 = vpop.f32.mrf.mxu0 }
 0x150   : > { %v891_v15 = vadd.f32 %v890_v4, %v3116_v43  ;;  %v1006_v2 = vmax.f32 %v887_v10, 0.0  ;;  %v1004_v4 = vmax.f32 %v883_v17, 0.0 }
 0x151   : > { %v892_v5 = vpop.f32.mrf.mxu0 }
 0x152   : > { %v893_v12 = vadd.f32 %v892_v5, %v3116_v43  ;;  %v1007_v60 = vmax.f32 %v891_v15, 0.0  ;;  %v873_v43 = vadd.f32 %v872_v56, %v3124_v47  ;;  %v863_v56 = vadd.f32 %v862_v37, %v3128_v49 }
 0x153   : > { %v894_v9 = vpop.f32.mrf.mxu0 }
 0x154   : > { %v895_v13 = vadd.f32 %v894_v9, %v3120_v45  ;;  %v1008_v1 = vmax.f32 %v893_v12, 0.0  ;;  %v881_v9 = vadd.f32 %v880_v61, %v3118_v44  ;;  %v1002_v12 = vmax.f32 %v877_v8, 0.0 }
 0x155   : > { %v896_v16 = vpop.f32.mrf.mxu0  ;;  %v857_v44 = vadd.f32 %v856_v34, %v3134_v52  ;;  %v871_v61 = vadd.f32 %v870_v42, %v3124_v47  ;;  %v1000_v41 = vmax.f32 %v873_v43, 0.0  ;;  %v861_v42 = vadd.f32 %v3170_v36, %v3128_v49 }
 0x156   : > { %v897_v18 = vadd.f32 %v896_v16, %v3120_v45  ;;  %v1009_v21 = vmax.f32 %v895_v13, 0.0  ;;  %v537_v45 = vpop.permute.xlu1 %536  ;;  %v1005_v13 = vmax.f32 %v885_v19, 0.0  ;;  %v1056_v16 = vpack.c.bf16 %v1006_v2, %v1004_v4 }
 0x157   : > { %v900_v23 = vpop.f32.mrf.mxu0  ;;  %v1054_v34 = vpack.c.bf16 %v1002_v12, %v1000_v41  ;;  %v996_v2 = vmax.f32 %v863_v56, 0.0  ;;  %v994_v4 = vmax.f32 %v857_v44, 0.0 }
 0x158   : > { %v1010_v5 = vmax.f32 %v897_v18, 0.0  ;;  %v901_v63 = vadd.f32 %v900_v23, %v532_v3  ;;  %v1057_v10 = vpack.c.bf16 %v1009_v21, %v1007_v60  ;;  %v865_v60 = vadd.f32 %v3177_v39, %v3130_v50 }
 0x159   : > { %v902_v62 = vpop.f32.mrf.mxu0  ;;  %v999_v23 = vmax.f32 %v871_v61, 0.0  ;;  %v841_v61 = vadd.f32 %v3144_v20, %v3136_v53 }
 0x15a   : > { %v1058_v55 = vpack.c.bf16 %v1010_v5, %v1008_v1  ;;  %v903_v18 = vadd.f32 %v902_v62, %v532_v3  ;;  %v1003_v1 = vmax.f32 %v881_v9, 0.0  ;;  %v1011_v17 = vmax.f32 %v901_v63, 0.0 }
 0x15b   : > { %v904_v59 = vpop.f32.mrf.mxu0  ;;  %v998_v62 = vmax.f32 %v867_v46, 0.0  ;;  %v1001_v3 = vmax.f32 %v875_v0, 0.0  ;;  %v847_v5 = vadd.f32 %v3154_v27, %v3138_v54  ;;  %v855_v9 = vadd.f32 %v3164_v32, %v3134_v52 }
 0x15c   : > { %v905_v57 = vadd.f32 %v904_v59, %v537_v45  ;;  %1459 = vmatprep.subr.bf16.mxu1 %v1058_v55  ;;  %v1055_v55 = vpack.c.bf16 %v1005_v13, %v1003_v1  ;;  %v1012_v21 = vmax.f32 %v903_v18, 0.0  ;;  %v997_v43 = vmax.f32 %v865_v60, 0.0 }
 0x15d   : > { %v906_v15 = vpop.f32.mrf.mxu0  ;;  %1460 = vmatpush1.bf16.msra.mxu1 %v1057_v10  ;;  %v1053_v49 = vpack.c.bf16 %v1001_v3, %v999_v23  ;;  %v1052_v63 = vpack.c.bf16 %v998_v62, %v996_v2  ;;  %v843_v46 = vadd.f32 %v3148_v24, %v3136_v53  ;;  %v851_v0 = vadd.f32 %v3158_v29, %v3132_v51 }
 0x15e   : > { %v1013_v48 = vmax.f32 %v905_v57, 0.0  ;;  %v907_v58 = vadd.f32 %v906_v15, %v537_v45  ;;  %1461 = vmatprep.subr.bf16.mxu1 %v1056_v16  ;;  %v853_v57 = vadd.f32 %v3162_v31, %v3132_v51  ;;  %v995_v13 = vmax.f32 %v861_v42, 0.0 }
 0x15f   : > { %v910_v19 = vpop.f32.mrf.mxu0  ;;  %v990_v12 = vmax.f32 %v847_v5, 0.0  ;;  %v993_v16 = vmax.f32 %v855_v9, 0.0  ;;  %v991_v1 = vmax.f32 %v851_v0, 0.0 }
 0x160   : > { %v3214_v37 = vpack.c.bf16 %v1013_v48, %v1011_v17  ;;  %v1014_v47 = vmax.f32 %v907_v58, 0.0  ;;  %v911_v39 = vadd.f32 %v910_v19, %v3193_v6  ;;  %v992_v59 = vmax.f32 %v853_v57, 0.0 }
 0x161   : > { %v912_v8 = vpop.f32.mrf.mxu0  ;;  %1462 = vmatpush1.bf16.msra.mxu1 %v1055_v55  ;;  %v1051_v18 = vpack.c.bf16 %v997_v43, %v995_v13  ;;  %v987_v58 = vmax.f32 %v841_v61, 0.0 }
 0x162   : > { %v3220_v50 = vpack.c.bf16 %v1014_v47, %v1012_v21  ;;  %1463 = vmatprep.subr.bf16.mxu1 %v1054_v34  ;;  %v913_v45 = vadd.f32 %v912_v8, %v3193_v6  ;;  %v1015_v52 = vmax.f32 %v911_v39, 0.0  ;;  %v845_v6 = vadd.f32 %v3152_v26, %v3138_v54 }
 0x163   : > { %v914_v36 = vpop.f32.mrf.mxu0  ;;  %v1050_v24 = vpack.c.bf16 %v994_v4, %v992_v59  ;;  %v1049_v26 = vpack.c.bf16 %v993_v16, %v991_v1  ;;  %v3771_v1 = vld [vmem:[#allocation3_spill] sm:$0xff] }
 0x164   : > { %v915_v31 = vadd.f32 %v914_v36, %v3198_v14  ;;  %v1016_v56 = vmax.f32 %v913_v45, 0.0  ;;  %v989_v54 = vmax.f32 %v845_v6, 0.0 }
 0x165   : > { %v916_v27 = vpop.f32.mrf.mxu0  ;;  %1464 = vmatpush1.bf16.msra.mxu1 %v1053_v49 }
 0x166   : > { %v1017_v32 = vmax.f32 %v915_v31, 0.0  ;;  %v917_v10 = vadd.f32 %v916_v27, %v3198_v14  ;;  %1465 = vmatprep.subr.bf16.mxu1 %v1052_v63  ;;  %v988_v14 = vmax.f32 %v843_v46, 0.0  ;;  %v1047_v62 = vpack.c.bf16 %v989_v54, %v987_v58 }
 0x167   : > { %v3236_v44 = vpop.f32.mrf.mxu0 }
 0x168   : > { %v3238_v51 = vpack.c.bf16 %v1017_v32, %v1015_v52  ;;  %v1018_v29 = vmax.f32 %v917_v10, 0.0  ;;  %v1048_v48 = vpack.c.bf16 %v990_v12, %v988_v14 }
 0x169   : > { %v3242_v15 = vpop.f32.mrf.mxu0  ;;  %1466 = vmatpush1.bf16.msra.mxu1 %v1051_v18 }
 0x16a   : > { %v3244_v41 = vpack.c.bf16 %v1018_v29, %v1016_v56  ;;  %1467 = vmatprep.subr.bf16.mxu1 %v1050_v24 }
 0x16b   : > { %v3246_v17 = vpop.f32.mrf.mxu0 }
 0x16d   : > { %v3248_v60 = vpop.f32.mrf.mxu0  ;;  %1468 = vmatpush1.bf16.msra.mxu1 %v1049_v26 }
 0x16e   : > { %1469 = vmatprep.subr.bf16.mxu1 %v1048_v48 }
 0x16f   : > { %v3250_v53 = vpop.f32.mrf.mxu0 }
 0x171   : > { %v3252_v20 = vpop.f32.mrf.mxu0  ;;  %1470 = vmatpush1.bf16.msra.mxu1 %v1047_v62 }
 0x172   : > { %1471 = vmatprep.subr.bf16.mxu1 %v3150_v25 }
 0x173   : > { %v3255_v3 = vpop.f32.mrf.mxu0 }
 0x175   : > { %v936_v55 = vpop.f32.mrf.mxu0  ;;  %1472 = vmatpush1.bf16.msra.mxu1 %v3146_v22 }
 0x176   : > { %1473 = vmatprep.subr.bf16.mxu1 %v3142_v11 }
 0x177   : > { %v940_v19 = vpop.f32.mrf.mxu0 }
 0x179   : > { %v942_v34 = vpop.f32.mrf.mxu0  ;;  %1474 = vmatpush1.bf16.msra.mxu1 %v3140_v7 }
 0x17b   : > { %v944_v21 = vpop.f32.mrf.mxu0 }
 0x17d   : > { %v946_v47 = vpop.f32.mrf.mxu0 }
 0x17f   : > { %v950_v42 = vpop.f32.mrf.mxu0 }
 0x180   : > { %v951_v29 = vadd.f32 %v950_v42, %v3175_v38 }
 0x181   : > { %v952_v23 = vpop.f32.mrf.mxu0 }
 0x182   : > { %v953_v10 = vadd.f32 %v952_v23, %v3175_v38 }
 0x183   : > { %v954_v8 = vpop.f32.mrf.mxu0 }
 0x184   : > { %v955_v12 = vadd.f32 %v954_v8, %v3179_v40  ;;  %v1032_v14 = vmax.f32 %v953_v10, 0.0  ;;  %v1031_v8 = vmax.f32 %v951_v29, 0.0  ;;  %v2566_v10 = vld [vmem:[%s3745_s3 + $0x60] ss:$8 sps:$4 sm:$0xff]   ;;  %v2581_v29 = vld [vmem:[%s3745_s3 + $0xb0] ss:$8 sps:$4 sm:$0xff]  }
 0x185   : > { %v956_v57 = vpop.f32.mrf.mxu0 }
 0x186   : > { %v957_v0 = vadd.f32 %v956_v57, %v3179_v40  ;;  %v1033_v26 = vmax.f32 %v955_v12, 0.0  ;;  %v3772_v40 = vld [vmem:[#allocation6_spill] sm:$0xff]  ;;  %v3773_v57 = vld [vmem:[#allocation5_spill] sm:$0xff]  ;;  %v2570_v12 = vld [vmem:[%s3745_s3 + $0x84] ss:$8 sps:$4 sm:$0xff]  }
 0x187   : > { %v960_v2 = vpop.f32.mrf.mxu0  ;;  %v937_v58 = vadd.f32 %v936_v55, %v3772_v40  ;;  %v933_v38 = vadd.f32 %v3252_v20, %v3773_v57 }
 0x188   : > { %v961_v52 = vadd.f32 %v960_v2, %v3166_v33 }
 0x189   : > { %v962_v39 = vpop.f32.mrf.mxu0  ;;  %v1026_v55 = vmax.f32 %v937_v58, 0.0  ;;  %v3388_v58 = vpop.permute.xlu0 %1211 }
 0x18a   : > { %v963_v63 = vadd.f32 %v962_v39, %v3166_v33  ;;  %v1035_v61 = vmax.f32 %v961_v52, 0.0  ;;  %v943_v33 = vadd.f32 %v942_v34, %v3771_v1  ;;  %v935_v34 = vadd.f32 %v3255_v3, %v3772_v40  ;;  %v3774_v39 = vld [vmem:[#allocation8_spill] sm:$0xff] }
 0x18b   : > { %v964_v25 = vpop.f32.mrf.mxu0  ;;  %v925_v3 = vadd.f32 %v3246_v17, %v3774_v39  ;;  %v2549_v17 = vld [vmem:[%s3745_s3 + $0x14] ss:$8 sps:$4 sm:$0xff]   ;;  %v2563_v52 = vld [vmem:[%s3745_s3 + $0x50] ss:$8 sps:$4 sm:$0xff]  }
 0x18c   : > { %v965_v31 = vadd.f32 %v964_v25, %v3168_v35  ;;  %v1036_v6 = vmax.f32 %v963_v63, 0.0  ;;  %v1028_v42 = vmax.f32 %v943_v33, 0.0  ;;  %v927_v25 = vadd.f32 %v3248_v60, %v3774_v39  ;;  %v2585_v33 = vld [vmem:[%s3745_s3 + $0xd4] ss:$8 sps:$4 sm:$0xff]   ;;  %v2593_v40 = vld [vmem:[%s3745_s3 + $0xf0] ss:$8 sps:$4 sm:$0xff]  }
 0x18d   : > { %v966_v5 = vpop.f32.mrf.mxu0  ;;  %v1021_v63 = vmax.f32 %v925_v3, 0.0 }
 0x18e   : > { %v967_v22 = vadd.f32 %v966_v5, %v3168_v35  ;;  %v1037_v16 = vmax.f32 %v965_v31, 0.0  ;;  %v1034_v35 = vmax.f32 %v957_v0, 0.0  ;;  %v2557_v0 = vld [vmem:[%s3745_s3 + $0x30] ss:$8 sps:$4 sm:$0xff]  }
 0x18f   : > { %v970_v9 = vpop.f32.mrf.mxu0 }
 0x190   : > { %v971_v7 = vadd.f32 %v970_v9, %v3156_v28  ;;  %v1038_v13 = vmax.f32 %v967_v22, 0.0  ;;  %v1071_v48 = vpack.c.bf16 %v1037_v16, %v1035_v61  ;;  %v1070_v23 = vpack.c.bf16 %v1034_v35, %v1032_v14  ;;  %v2572_v16 = vld [vmem:[%s3745_s3 + $0x80] ss:$8 sps:$4 sm:$0xff]   ;;  %v2582_v61 = vld [vmem:[%s3745_s3 + $0xc4] ss:$8 sps:$4 sm:$0xff]  }
 0x191   : > { %v972_v43 = vpop.f32.mrf.mxu0  ;;  %v1025_v22 = vmax.f32 %v935_v34, 0.0  ;;  %v2578_v35 = vld [vmem:[%s3745_s3 + $0xa0] ss:$8 sps:$4 sm:$0xff]   ;;  %v2587_v14 = vld [vmem:[%s3745_s3 + $0xd0] ss:$8 sps:$4 sm:$0xff]  }
 0x192   : > { %v973_v11 = vadd.f32 %v972_v43, %v3156_v28  ;;  %v1039_v32 = vmax.f32 %v971_v7, 0.0  ;;  %v1072_v56 = vpack.c.bf16 %v1038_v13, %v1036_v6  ;;  %v3775_v43 = vld [vmem:[#allocation7_spill] sm:$0xff]  ;;  %v2567_v6 = vld [vmem:[%s3745_s3 + $0x74] ss:$8 sps:$4 sm:$0xff]  }
 0x193   : > { %v974_v49 = vpop.f32.mrf.mxu0  ;;  %v923_v20 = vadd.f32 %v3242_v15, %v3775_v43  ;;  %v921_v60 = vadd.f32 %v3236_v44, %v3775_v43  ;;  %v2546_v44 = vld [vmem:[%s3745_s3] ss:$8 sps:$4 sm:$0xff]   ;;  %v2558_v13 = vld [vmem:[%s3745_s3 + $0x44] ss:$8 sps:$4 sm:$0xff]  }
 0x194   : > { %v975_v36 = vadd.f32 %v974_v49, %v3160_v30  ;;  %v1040_v27 = vmax.f32 %v973_v11, 0.0  ;;  %v1024_v49 = vmax.f32 %v933_v38, 0.0 }
 0x195   : > { %v976_v4 = vpop.f32.mrf.mxu0  ;;  %v1019_v15 = vmax.f32 %v921_v60, 0.0 }
 0x196   : > { %v977_v45 = vadd.f32 %v976_v4, %v3160_v30  ;;  %v1041_v46 = vmax.f32 %v975_v36, 0.0  ;;  %v3770_v30 = vld [vmem:[#allocation4_spill] sm:$0xff]  ;;  %v1022_v36 = vmax.f32 %v927_v25, 0.0  ;;  %v1066_v7 = vpack.c.bf16 %v1026_v55, %v1024_v49 }
 0x197   : > { %v947_v24 = vadd.f32 %v946_v47, %v3770_v30  ;;  %v945_v54 = vadd.f32 %v944_v21, %v3770_v30  ;;  %v941_v47 = vadd.f32 %v940_v19, %v3771_v1  ;;  %v1069_v21 = vpack.c.bf16 %v1033_v26, %v1031_v8  ;;  %v2575_v30 = vld [vmem:[%s3745_s3 + $0x90] ss:$8 sps:$4 sm:$0xff]   ;;  %v2584_v1 = vld [vmem:[%s3745_s3 + $0xc0] ss:$8 sps:$4 sm:$0xff]  }
 0x198   : > { %v1042_v59 = vmax.f32 %v977_v45, 0.0  ;;  %v1073_v18 = vpack.c.bf16 %v1041_v46, %v1039_v32  ;;  %v931_v19 = vadd.f32 %v3250_v53, %v3773_v57  ;;  %v1020_v53 = vmax.f32 %v923_v20, 0.0  ;;  %v2564_v32 = vld [vmem:[%s3745_s3 + $0x64] ss:$8 sps:$4 sm:$0xff]   ;;  %v2590_v26 = vld [vmem:[%s3745_s3 + $0xe0] ss:$8 sps:$4 sm:$0xff]  }
 0x199   : > { %v1030_v62 = vmax.f32 %v947_v24, 0.0  ;;  %v1029_v2 = vmax.f32 %v945_v54, 0.0  ;;  %v1027_v9 = vmax.f32 %v941_v47, 0.0  ;;  %v1063_v46 = vpack.c.bf16 %v1021_v63, %v1019_v15  ;;  %v2576_v24 = vld [vmem:[%s3745_s3 + $0xa4] ss:$8 sps:$4 sm:$0xff]  }
 0x19a   : > { %v1074_v28 = vpack.c.bf16 %v1042_v59, %v1040_v27  ;;  %v1023_v4 = vmax.f32 %v931_v19, 0.0  ;;  %v1064_v31 = vpack.c.bf16 %v1022_v36, %v1020_v53  ;;  %v2560_v27 = vld [vmem:[%s3745_s3 + $0x40] ss:$8 sps:$4 sm:$0xff]   ;;  %v2561_v59 = vld [vmem:[%s3745_s3 + $0x54] ss:$8 sps:$4 sm:$0xff]  }
 0x19b   : > { %v1068_v5 = vpack.c.bf16 %v1030_v62, %v1028_v42  ;;  %v1067_v11 = vpack.c.bf16 %v1029_v2, %v1027_v9  ;;  %v2588_v54 = vld [vmem:[%s3745_s3 + $0xe4] ss:$8 sps:$4 sm:$0xff]   ;;  %v3390_v62 = vpop.permute.xlu1 %1216 }
 0x19c   : > { %1475 = vmatprep.subr.bf16.mxu1 %v1074_v28  ;;  %v1065_v45 = vpack.c.bf16 %v1025_v22, %v1023_v4  ;;  %v2569_v28 = vld [vmem:[%s3745_s3 + $0x70] ss:$8 sps:$4 sm:$0xff]  }
 0x19d   : > { %1476 = vmatpush2.bf16.msra.mxu1 %v1073_v18  ;;  %v2573_v18 = vld [vmem:[%s3745_s3 + $0x94] ss:$8 sps:$4 sm:$0xff]  }
 0x19e   : > { %1477 = vmatprep.subr.bf16.mxu1 %v1072_v56  ;;  %v2579_v56 = vld [vmem:[%s3745_s3 + $0xb4] ss:$8 sps:$4 sm:$0xff]  }
 0x19f   : > { %v3394_v47 = vpop.permute.xlu1 %1206 }
 0x1a1   : > { %1478 = vmatpush2.bf16.msra.mxu1 %v1071_v48  ;;  %v2591_v48 = vld [vmem:[%s3745_s3 + $0xf4] ss:$8 sps:$4 sm:$0xff]  }
 0x1a2   : > { %1479 = vmatprep.subr.bf16.mxu1 %v1070_v23  ;;  %v3392_v23 = vpop.permute.xlu0 %1201 }
 0x1a3   : > { %v3398_v57 = vpop.permute.xlu1 %1196 }
 0x1a5   : > { %1480 = vmatpush2.bf16.msra.mxu1 %v1069_v21 }
 0x1a6   : > { %1481 = vmatprep.subr.bf16.mxu1 %v1068_v5  ;;  %v3396_v8 = vpop.permute.xlu0 %1191 }
 0x1a7   : > { %v3402_v42 = vpop.permute.xlu1 %1186 }
 0x1a9   : > { %1482 = vmatpush2.bf16.msra.mxu1 %v1067_v11 }
 0x1aa   : > { %1483 = vmatprep.subr.bf16.mxu1 %v1066_v7  ;;  %v3400_v38 = vpop.permute.xlu0 %1181 }
 0x1ab   : > { %v3406_v2 = vpop.permute.xlu1 %1176 }
 0x1ad   : > { %1484 = vmatpush2.bf16.msra.mxu1 %v1065_v45 }
 0x1ae   : > { %1485 = vmatprep.subr.bf16.mxu1 %v1064_v31  ;;  %v3404_v34 = vpop.permute.xlu0 %1171 }
 0x1af   : > { %v3410_v39 = vpop.permute.xlu1 %1166 }
 0x1b1   : > { %1486 = vmatpush2.bf16.msra.mxu1 %v1063_v46 }
 0x1b2   : > { %1487 = vmatprep.subr.bf16.mxu1 %v3244_v41  ;;  %v2551_v41 = vld [vmem:[%s3745_s3 + $0x10] ss:$8 sps:$4 sm:$0xff]   ;;  %v3408_v21 = vpop.permute.xlu0 %1161 }
 0x1b3   : > { %v1157_v55 = vpop.permute.xlu1 %1156 }
 0x1b5   : > { %1488 = vmatpush2.bf16.msra.mxu1 %v3238_v51  ;;  %v2555_v51 = vld [vmem:[%s3745_s3 + $0x34] ss:$8 sps:$4 sm:$0xff]  }
 0x1b6   : > { %1489 = vmatprep.subr.bf16.mxu1 %v3220_v50  ;;  %v2552_v50 = vld [vmem:[%s3745_s3 + $0x24] ss:$8 sps:$4 sm:$0xff]   ;;  %v1152_v25 = vpop.permute.xlu0 %1151 }
 0x1b7   : > { %v1147_v20 = vpop.permute.xlu1 %1146 }
 0x1b9   : > { %1490 = vmatpush2.bf16.msra.mxu1 %v3214_v37  ;;  %v2554_v37 = vld [vmem:[%s3745_s3 + $0x20] ss:$8 sps:$4 sm:$0xff]  }
 0x1ba   : > { %v1142_v19 = vpop.permute.xlu0 %1141 }
 0x1bc   : > { %1492 = vmatmul.mubr.bf16.vlgmr.msra.gmra.mxu1 %v2546_v44 }
 0x1bd   : > { %1501 = vmatprep.mubr.bf16.mxu1 %v2549_v17 }
 0x1c4   : > { %1502 = vmatmul.mubr.bf16.gmra.mxu1 %v2551_v41 }
 0x1c5   : > { %1511 = vmatprep.mubr.bf16.mxu1 %v2552_v50 }
 0x1cc   : > { %1512 = vmatmul.mubr.bf16.gmra.mxu1 %v2554_v37 }
 0x1cd   : > { %1521 = vmatprep.mubr.bf16.mxu1 %v2555_v51 }
 0x1d4   : > { %1522 = vmatmul.mubr.bf16.gmra.mxu1 %v2557_v0 }
 0x1d5   : > { %1531 = vmatprep.mubr.bf16.mxu1 %v2558_v13 }
 0x1dc   : > { %1532 = vmatmul.mubr.bf16.gmra.mxu1 %v2560_v27 }
 0x1dd   : > { %1541 = vmatprep.mubr.bf16.mxu1 %v2561_v59 }
 0x1e4   : > { %1542 = vmatmul.mubr.bf16.gmra.mxu1 %v2563_v52 }
 0x1e5   : > { %1551 = vmatprep.mubr.bf16.mxu1 %v2564_v32 }
 0x1ec   : > { %1552 = vmatmul.mubr.bf16.gmra.mxu1 %v2566_v10 }
 0x1ed   : > { %1561 = vmatprep.mubr.bf16.mxu1 %v2567_v6 }
 0x1f4   : > { %1562 = vmatmul.mubr.bf16.gmra.mxu1 %v2569_v28 }
 0x1f5   : > { %1571 = vmatprep.mubr.bf16.mxu1 %v2570_v12  ;;  %v3428_v12 = vpop.permute.xlu0 %1291 }
 0x1fc   : > { %1572 = vmatmul.mubr.bf16.gmra.mxu1 %v2572_v16 }
 0x1fd   : > { %1581 = vmatprep.mubr.bf16.mxu1 %v2573_v18  ;;  %v3432_v18 = vpop.permute.xlu1 %1296 }
 0x204   : > { %1582 = vmatmul.mubr.bf16.gmra.mxu1 %v2575_v30 }
 0x205   : > { %1591 = vmatprep.mubr.bf16.mxu1 %v2576_v24 }
 0x20c   : > { %1592 = vmatmul.mubr.bf16.gmra.mxu1 %v2578_v35  ;;  %v3438_v35 = vpop.permute.xlu0 %1281 }
 0x20d   : > { %1601 = vmatprep.mubr.bf16.mxu1 %v2579_v56 }
 0x214   : > { %1602 = vmatmul.mubr.bf16.gmra.mxu1 %v2581_v29  ;;  %v3442_v29 = vpop.permute.xlu1 %1286 }
 0x215   : > { %1611 = vmatprep.mubr.bf16.mxu1 %v2582_v61 }
 0x21c   : > { %1612 = vmatmul.mubr.bf16.gmra.mxu1 %v2584_v1 }
 0x21d   : > { %1621 = vmatprep.mubr.bf16.mxu1 %v2585_v33  ;;  %v2596_v33 = vld [vmem:[%s3747_s5 + $0x4] ss:$8 sps:$4 sm:$0xff]  }
 0x21e   : > { %1972 = vmatprep.mubr.bf16.mxu0 %v2596_v33 }
 0x224   : > { %1622 = vmatmul.mubr.bf16.gmra.mxu1 %v2587_v14  ;;  %v2599_v14 = vld [vmem:[%s3747_s5 + $0x44] ss:$8 sps:$4 sm:$0xff]  }
 0x225   : > { %1631 = vmatprep.mubr.bf16.mxu1 %v2588_v54  ;;  %v3454_v54 = vpop.permute.xlu0 %1271 }
 0x22c   : > { %1632 = vmatmul.mubr.bf16.gmra.mxu1 %v2590_v26 }
 0x22d   : > { %1641 = vmatprep.mubr.bf16.mxu1 %v2591_v48  ;;  %v3458_v48 = vpop.permute.xlu1 %1276 }
 0x234   : > { %1642 = vmatmul.mubr.bf16.gmra.mxu1 %v2593_v40 }
 0x235   : > { %2012 = vmatprep.mubr.bf16.mxu1 %v2599_v14 }
 0x27c   : > { %v1493_v5 = vpop.f32.mrf.mxu1 }
 0x27d   : > { %v1494_v43 = vadd.f32 %v1493_v5, %v1142_v19 }
 0x27e   : > { %v1495_v9 = vpop.f32.mrf.mxu1 }
 0x27f   : > { %v1496_v3 = vadd.f32 %v1495_v9, %v1142_v19  ;;  %v1652_v36 = vmax.f32 %v1494_v43, 0.0  ;;  %v3462_v19 = vpop.permute.xlu1 %1266 }
 0x280   : > { %v1497_v49 = vpop.f32.mrf.mxu1  ;;  %3777 = vst [vmem:[#allocation3_spill] sm:$0xff] %v3462_v19 }
 0x281   : > { %v1498_v22 = vadd.f32 %v1497_v49, %v1147_v20  ;;  %v1653_v53 = vmax.f32 %v1496_v3, 0.0 }
 0x282   : > { %v1499_v11 = vpop.f32.mrf.mxu1 }
 0x283   : > { %v1654_v7 = vmax.f32 %v1498_v22, 0.0  ;;  %v1500_v60 = vadd.f32 %v1499_v11, %v1147_v20  ;;  %v3466_v3 = vpop.permute.xlu1 %1256 }
 0x284   : > { %v1503_v4 = vpop.f32.mrf.mxu1  ;;  %3779 = vst [vmem:[#allocation5_spill] sm:$0xff] %v3466_v3 }
 0x285   : > { %v3412_v63 = vpack.c.bf16 %v1654_v7, %v1652_v36  ;;  %v1655_v45 = vmax.f32 %v1500_v60, 0.0  ;;  %v1504_v46 = vadd.f32 %v1503_v4, %v1152_v25 }
 0x286   : > { %v1505_v31 = vpop.f32.mrf.mxu1 }
 0x287   : > { %v3414_v15 = vpack.c.bf16 %v1655_v45, %v1653_v53  ;;  %v1506_v17 = vadd.f32 %v1505_v31, %v1152_v25  ;;  %v1656_v37 = vmax.f32 %v1504_v46, 0.0  ;;  %v3470_v60 = vpop.permute.xlu1 %1246 }
 0x288   : > { %v1507_v44 = vpop.f32.mrf.mxu1  ;;  %3781 = vst [vmem:[#allocation7_spill] sm:$0xff] %v3470_v60 }
 0x289   : > { %v1508_v41 = vadd.f32 %v1507_v44, %v1157_v55  ;;  %v1657_v27 = vmax.f32 %v1506_v17, 0.0 }
 0x28a   : > { %v1509_v50 = vpop.f32.mrf.mxu1 }
 0x28b   : > { %v1658_v51 = vmax.f32 %v1508_v41, 0.0  ;;  %v1510_v0 = vadd.f32 %v1509_v50, %v1157_v55  ;;  %v3460_v55 = vpop.permute.xlu0 %1261  ;;  %v3477_v41 = vpop.permute.xlu1 %1236 }
 0x28c   : > { %v3416_v13 = vpop.f32.mrf.mxu1  ;;  %3776 = vst [vmem:[#allocation4_spill] sm:$0xff] %v3460_v55 }
 0x28d   : > { %v3418_v59 = vpack.c.bf16 %v1658_v51, %v1656_v37  ;;  %v1659_v52 = vmax.f32 %v1510_v0, 0.0 }
 0x28e   : > { %v3420_v32 = vpop.f32.mrf.mxu1 }
 0x28f   : > { %v3422_v10 = vpack.c.bf16 %v1659_v52, %v1657_v27  ;;  %v3464_v20 = vpop.permute.xlu0 %1251 }
 0x290   : > { %v3424_v6 = vpop.f32.mrf.mxu1  ;;  %3778 = vst [vmem:[#allocation6_spill] sm:$0xff] %v3464_v20 }
 0x292   : > { %v3426_v28 = vpop.f32.mrf.mxu1 }
 0x293   : > { %v3468_v36 = vpop.permute.xlu0 %1241 }
 0x294   : > { %v3430_v16 = vpop.f32.mrf.mxu1  ;;  %3780 = vst [vmem:[#allocation8_spill] sm:$0xff] %v3468_v36 }
 0x296   : > { %v3434_v30 = vpop.f32.mrf.mxu1 }
 0x297   : > { %v3472_v45 = vpop.permute.xlu0 %1231 }
 0x298   : > { %v3436_v24 = vpop.f32.mrf.mxu1 }
 0x29a   : > { %v3440_v56 = vpop.f32.mrf.mxu1 }
 0x29b   : > { %v1222_v60 = vpop.permute.xlu0 %1221 }
 0x29c   : > { %v3444_v61 = vpop.f32.mrf.mxu1 }
 0x29e   : > { %v3446_v1 = vpop.f32.mrf.mxu1 }
 0x2a0   : > { %v3456_v26 = vpop.f32.mrf.mxu1 }
 0x2a2   : > { %v1539_v40 = vpop.f32.mrf.mxu1 }
 0x2a4   : > { %v1543_v25 = vpop.f32.mrf.mxu1 }
 0x2a6   : > { %v1545_v5 = vpop.f32.mrf.mxu1 }
 0x2a8   : > { %v1547_v9 = vpop.f32.mrf.mxu1 }
 0x2aa   : > { %v1549_v43 = vpop.f32.mrf.mxu1 }
 0x2ab   : > { %v1550_v14 = vadd.f32 %v1549_v43, %v3398_v57 }
 0x2ac   : > { %v1553_v49 = vpop.f32.mrf.mxu1 }
 0x2ae   : > { %v1555_v22 = vpop.f32.mrf.mxu1 }
 0x2af   : > { %v1556_v51 = vadd.f32 %v1555_v22, %v3392_v23 }
 0x2b0   : > { %v1557_v11 = vpop.f32.mrf.mxu1 }
 0x2b1   : > { %v1558_v27 = vadd.f32 %v1557_v11, %v3394_v47  ;;  %v1548_v11 = vadd.f32 %v1547_v9, %v3398_v57 }
 0x2b2   : > { %v1559_v7 = vpop.f32.mrf.mxu1 }
 0x2b3   : > { %v1560_v46 = vadd.f32 %v1559_v7, %v3394_v47  ;;  %v1540_v47 = vadd.f32 %v1539_v40, %v3402_v42 }
 0x2b4   : > { %v1563_v4 = vpop.f32.mrf.mxu1 }
 0x2b5   : > { %v1564_v50 = vadd.f32 %v1563_v4, %v3388_v58  ;;  %v1679_v7 = vmax.f32 %v1560_v46, 0.0  ;;  %v1677_v4 = vmax.f32 %v1556_v51, 0.0 }
 0x2b6   : > { %v1565_v53 = vpop.f32.mrf.mxu1 }
 0x2b7   : > { %v1566_v44 = vadd.f32 %v1565_v53, %v3388_v58  ;;  %v1680_v20 = vmax.f32 %v1564_v50, 0.0  ;;  %v1546_v58 = vadd.f32 %v1545_v5, %v3396_v8  ;;  %v1536_v5 = vadd.f32 %v3446_v1, %v3400_v38 }
 0x2b8   : > { %v1567_v31 = vpop.f32.mrf.mxu1 }
 0x2b9   : > { %v1568_v17 = vadd.f32 %v1567_v31, %v3390_v62  ;;  %v1681_v36 = vmax.f32 %v1566_v44, 0.0  ;;  %v1554_v31 = vadd.f32 %v1553_v49, %v3392_v23  ;;  %v1675_v44 = vmax.f32 %v1550_v14, 0.0 }
 0x2ba   : > { %v1569_v37 = vpop.f32.mrf.mxu1  ;;  %v1530_v23 = vadd.f32 %v3440_v56, %v3406_v2  ;;  %v1544_v49 = vadd.f32 %v1543_v25, %v3396_v8  ;;  %v1673_v57 = vmax.f32 %v1546_v58, 0.0  ;;  %v1674_v56 = vmax.f32 %v1548_v11, 0.0 }
 0x2bb   : > { %v1570_v0 = vadd.f32 %v1569_v37, %v3390_v62  ;;  %v1682_v52 = vmax.f32 %v1568_v17, 0.0  ;;  %v1227_v62 = vpop.permute.xlu1 %1226  ;;  %v1678_v17 = vmax.f32 %v1558_v27, 0.0  ;;  %v1729_v37 = vpack.c.bf16 %v1679_v7, %v1677_v4 }
 0x2bc   : > { %v1573_v33 = vpop.f32.mrf.mxu1  ;;  %v1676_v40 = vmax.f32 %v1554_v31, 0.0  ;;  %v1727_v1 = vpack.c.bf16 %v1675_v44, %v1673_v57  ;;  %v1526_v14 = vadd.f32 %v3434_v30, %v3404_v34  ;;  %v1667_v4 = vmax.f32 %v1530_v23, 0.0 }
 0x2bd   : > { %v1683_v53 = vmax.f32 %v1570_v0, 0.0  ;;  %v1574_v55 = vadd.f32 %v1573_v33, %v1222_v60  ;;  %v1730_v43 = vpack.c.bf16 %v1682_v52, %v1680_v20  ;;  %v1534_v33 = vadd.f32 %v3444_v61, %v3400_v38 }
 0x2be   : > { %v1575_v3 = vpop.f32.mrf.mxu1  ;;  %v1728_v51 = vpack.c.bf16 %v1678_v17, %v1676_v40  ;;  %v1528_v38 = vadd.f32 %v3436_v24, %v3406_v2  ;;  %v1524_v11 = vadd.f32 %v3430_v16, %v3404_v34  ;;  %v1665_v2 = vmax.f32 %v1526_v14, 0.0 }
 0x2bf   : > { %v1731_v22 = vpack.c.bf16 %v1683_v53, %v1681_v36  ;;  %v1576_v0 = vadd.f32 %v1575_v3, %v1222_v60  ;;  %v1684_v9 = vmax.f32 %v1574_v55, 0.0  ;;  %v1538_v3 = vadd.f32 %v3456_v26, %v3402_v42 }
 0x2c0   : > { %v1577_v46 = vpop.f32.mrf.mxu1  ;;  %v1671_v60 = vmax.f32 %v1540_v47, 0.0  ;;  %v1672_v55 = vmax.f32 %v1544_v49, 0.0  ;;  %v1669_v42 = vmax.f32 %v1536_v5, 0.0  ;;  %v1520_v53 = vadd.f32 %v3426_v28, %v3410_v39 }
 0x2c1   : > { %v1578_v19 = vadd.f32 %v1577_v46, %v1227_v62  ;;  %1940 = vmatprep.subr.bf16.mxu0 %v1731_v22  ;;  %2478 = vmatprep.subr.bf16.mxu1 %v1731_v22  ;;  %v1685_v52 = vmax.f32 %v1576_v0, 0.0  ;;  %v1670_v61 = vmax.f32 %v1538_v3, 0.0  ;;  %v1516_v47 = vadd.f32 %v3420_v32, %v3408_v21 }
 0x2c2   : > { %v1579_v36 = vpop.f32.mrf.mxu1  ;;  %1941 = vmatpush1.bf16.msra.mxu0 %v1730_v43  ;;  %2494 = vmatpush1.bf16.msra.mxu1 %v1730_v43  ;;  %v1726_v31 = vpack.c.bf16 %v1674_v56, %v1672_v55  ;;  %v1725_v22 = vpack.c.bf16 %v1671_v60, %v1669_v42  ;;  %v1668_v17 = vmax.f32 %v1534_v33, 0.0  ;;  %v1663_v44 = vmax.f32 %v1520_v53, 0.0 }
 0x2c3   : > { %v1686_v20 = vmax.f32 %v1578_v19, 0.0  ;;  %v1580_v50 = vadd.f32 %v1579_v36, %v1227_v62  ;;  %1942 = vmatprep.subr.bf16.mxu0 %v1729_v37  ;;  %2479 = vmatprep.subr.bf16.mxu1 %v1729_v37  ;;  %v1666_v37 = vmax.f32 %v1528_v38, 0.0  ;;  %v1723_v34 = vpack.c.bf16 %v1667_v4, %v1665_v2 }
 0x2c4   : > { %v1583_v27 = vpop.f32.mrf.mxu1  ;;  %v1724_v32 = vpack.c.bf16 %v1670_v61, %v1668_v17  ;;  %v1514_v49 = vadd.f32 %v3416_v13, %v3408_v21  ;;  %v1664_v40 = vmax.f32 %v1524_v11, 0.0  ;;  %v1661_v36 = vmax.f32 %v1516_v47, 0.0 }
 0x2c5   : > { %v3495_v8 = vpack.c.bf16 %v1686_v20, %v1684_v9  ;;  %v1687_v25 = vmax.f32 %v1580_v50, 0.0  ;;  %v1584_v7 = vadd.f32 %v1583_v27, %v3472_v45 }
 0x2c6   : > { %v1585_v19 = vpop.f32.mrf.mxu1  ;;  %1943 = vmatpush1.bf16.msra.mxu0 %v1728_v51  ;;  %2495 = vmatpush1.bf16.msra.mxu1 %v1728_v51  ;;  %v1722_v57 = vpack.c.bf16 %v1666_v37, %v1664_v40  ;;  %v1721_v20 = vpack.c.bf16 %v1663_v44, %v1661_v36  ;;  %v1660_v50 = vmax.f32 %v1514_v49, 0.0 }
 0x2c7   : > { %v3501_v26 = vpack.c.bf16 %v1687_v25, %v1685_v52  ;;  %1944 = vmatprep.subr.bf16.mxu0 %v1727_v1  ;;  %2480 = vmatprep.subr.bf16.mxu1 %v1727_v1  ;;  %v1586_v30 = vadd.f32 %v1585_v19, %v3472_v45  ;;  %v1688_v24 = vmax.f32 %v1584_v7, 0.0  ;;  %v1518_v45 = vadd.f32 %v3424_v6, %v3410_v39 }
 0x2c8   : > { %v1587_v58 = vpop.f32.mrf.mxu1 }
 0x2c9   : > { %v1588_v62 = vadd.f32 %v1587_v58, %v3477_v41  ;;  %v1689_v16 = vmax.f32 %v1586_v30, 0.0  ;;  %v1662_v6 = vmax.f32 %v1518_v45, 0.0 }
 0x2ca   : > { %v1589_v28 = vpop.f32.mrf.mxu1  ;;  %1945 = vmatpush1.bf16.msra.mxu0 %v1726_v31  ;;  %2496 = vmatpush1.bf16.msra.mxu1 %v1726_v31 }
 0x2cb   : > { %v1690_v43 = vmax.f32 %v1588_v62, 0.0  ;;  %v1590_v46 = vadd.f32 %v1589_v28, %v3477_v41  ;;  %1946 = vmatprep.subr.bf16.mxu0 %v1725_v22  ;;  %2481 = vmatprep.subr.bf16.mxu1 %v1725_v22  ;;  %v1720_v21 = vpack.c.bf16 %v1662_v6, %v1660_v50 }
 0x2cc   : > { %v3517_v0 = vpop.f32.mrf.mxu1 }
 0x2cd   : > { %v3519_v23 = vpack.c.bf16 %v1690_v43, %v1688_v24  ;;  %v1691_v5 = vmax.f32 %v1590_v46, 0.0 }
 0x2ce   : > { %v3523_v41 = vpop.f32.mrf.mxu1  ;;  %1947 = vmatpush1.bf16.msra.mxu0 %v1724_v32  ;;  %2497 = vmatpush1.bf16.msra.mxu1 %v1724_v32 }
 0x2cf   : > { %v3525_v39 = vpack.c.bf16 %v1691_v5, %v1689_v16  ;;  %1948 = vmatprep.subr.bf16.mxu0 %v1723_v34  ;;  %2482 = vmatprep.subr.bf16.mxu1 %v1723_v34 }
 0x2d0   : > { %v3527_v9 = vpop.f32.mrf.mxu1 }
 0x2d2   : > { %v3529_v3 = vpop.f32.mrf.mxu1  ;;  %1949 = vmatpush1.bf16.msra.mxu0 %v1722_v57  ;;  %2498 = vmatpush1.bf16.msra.mxu1 %v1722_v57 }
 0x2d3   : > { %1950 = vmatprep.subr.bf16.mxu0 %v1721_v20  ;;  %2483 = vmatprep.subr.bf16.mxu1 %v1721_v20  ;;  %v3784_v20 = vld [vmem:[#allocation5_spill] sm:$0xff] }
 0x2d4   : > { %v3531_v13 = vpop.f32.mrf.mxu1 }
 0x2d6   : > { %v3533_v60 = vpop.f32.mrf.mxu1  ;;  %1951 = vmatpush1.bf16.msra.mxu0 %v1720_v21  ;;  %2499 = vmatpush1.bf16.msra.mxu1 %v1720_v21 }
 0x2d7   : > { %1952 = vmatprep.subr.bf16.mxu0 %v3422_v10  ;;  %2484 = vmatprep.subr.bf16.mxu1 %v3422_v10 }
 0x2d8   : > { %v3537_v56 = vpop.f32.mrf.mxu1 }
 0x2da   : > { %v1609_v51 = vpop.f32.mrf.mxu1  ;;  %1953 = vmatpush1.bf16.msra.mxu0 %v3418_v59  ;;  %2500 = vmatpush1.bf16.msra.mxu1 %v3418_v59 }
 0x2db   : > { %1954 = vmatprep.subr.bf16.mxu0 %v3414_v15  ;;  %2485 = vmatprep.subr.bf16.mxu1 %v3414_v15  ;;  %v1610_v50 = vadd.f32 %v1609_v51, %v3784_v20 }
 0x2dc   : > { %v1613_v27 = vpop.f32.mrf.mxu1 }
 0x2de   : > { %v1615_v1 = vpop.f32.mrf.mxu1  ;;  %1955 = vmatpush1.bf16.msra.mxu0 %v3412_v63  ;;  %2501 = vmatpush1.bf16.msra.mxu1 %v3412_v63 }
 0x2e0   : > { %v1617_v52 = vpop.f32.mrf.mxu1 }
 0x2e2   : > { %v1619_v25 = vpop.f32.mrf.mxu1 }
 0x2e4   : > { %v1623_v10 = vpop.f32.mrf.mxu1 }
 0x2e5   : > { %v1624_v5 = vadd.f32 %v1623_v10, %v3454_v54 }
 0x2e6   : > { %v1625_v33 = vpop.f32.mrf.mxu1 }
 0x2e7   : > { %v1626_v46 = vadd.f32 %v1625_v33, %v3454_v54  ;;  %v3785_v54 = vld [vmem:[#allocation6_spill] sm:$0xff] }
 0x2e8   : > { %v1627_v55 = vpop.f32.mrf.mxu1  ;;  %v1606_v10 = vadd.f32 %v3533_v60, %v3785_v54  ;;  %v3787_v60 = vld [vmem:[#allocation8_spill] sm:$0xff] }
 0x2e9   : > { %v1628_v44 = vadd.f32 %v1627_v55, %v3458_v48  ;;  %v1705_v36 = vmax.f32 %v1626_v46, 0.0  ;;  %v1704_v55 = vmax.f32 %v1624_v5, 0.0  ;;  %v2616_v46 = vld [vmem:[%s3747_s5 + $0x30] ss:$8 sps:$4 sm:$0xff]  }
 0x2ea   : > { %v1629_v19 = vpop.f32.mrf.mxu1 }
 0x2eb   : > { %v1630_v11 = vadd.f32 %v1629_v19, %v3458_v48  ;;  %v1706_v6 = vmax.f32 %v1628_v44, 0.0  ;;  %v1788_v44 = vpop.permute.xlu1 %1787 }
 0x2ec   : > { %v1633_v14 = vpop.f32.mrf.mxu1 }
 0x2ed   : > { %v1634_v24 = vadd.f32 %v1633_v14, %v3438_v35  ;;  %v1742_v14 = vpack.c.bf16 %v1706_v6, %v1704_v55 }
 0x2ee   : > { %v1635_v42 = vpop.f32.mrf.mxu1 }
 0x2ef   : > { %v1636_v22 = vadd.f32 %v1635_v42, %v3438_v35  ;;  %v1708_v49 = vmax.f32 %v1634_v24, 0.0  ;;  %v3783_v35 = vld [vmem:[#allocation4_spill] sm:$0xff]  ;;  %v3786_v42 = vld [vmem:[#allocation7_spill] sm:$0xff]  ;;  %v2612_v24 = vld [vmem:[%s3747_s5 + $0x34] ss:$8 sps:$4 sm:$0xff]  }
 0x2f0   : > { %v1637_v7 = vpop.f32.mrf.mxu1  ;;  %v1616_v40 = vadd.f32 %v1615_v1, %v3783_v35  ;;  %v1614_v33 = vadd.f32 %v1613_v27, %v3783_v35  ;;  %v1600_v51 = vadd.f32 %v3529_v3, %v3786_v42  ;;  %v1604_v27 = vadd.f32 %v3531_v13, %v3785_v54 }
 0x2f1   : > { %v1638_v62 = vadd.f32 %v1637_v7, %v3442_v29  ;;  %v1709_v45 = vmax.f32 %v1636_v22, 0.0  ;;  %v1699_v7 = vmax.f32 %v1610_v50, 0.0 }
 0x2f2   : > { %v1639_v59 = vpop.f32.mrf.mxu1  ;;  %v1701_v1 = vmax.f32 %v1616_v40, 0.0  ;;  %v1695_v3 = vmax.f32 %v1600_v51, 0.0  ;;  %v1696_v13 = vmax.f32 %v1604_v27, 0.0 }
 0x2f3   : > { %v1640_v15 = vadd.f32 %v1639_v59, %v3442_v29  ;;  %v1710_v37 = vmax.f32 %v1638_v62, 0.0  ;;  %v1707_v29 = vmax.f32 %v1630_v11, 0.0  ;;  %v2606_v11 = vld [vmem:[%s3747_s5 + $0x24] ss:$8 sps:$4 sm:$0xff]  }
 0x2f4   : > { %v1643_v53 = vpop.f32.mrf.mxu1 }
 0x2f5   : > { %v1644_v63 = vadd.f32 %v1643_v53, %v3428_v12  ;;  %v1711_v17 = vmax.f32 %v1640_v15, 0.0  ;;  %v1744_v57 = vpack.c.bf16 %v1710_v37, %v1708_v49  ;;  %v1700_v53 = vmax.f32 %v1614_v33, 0.0 }
 0x2f6   : > { %v1645_v38 = vpop.f32.mrf.mxu1 }
 0x2f7   : > { %v1646_v31 = vadd.f32 %v1645_v38, %v3428_v12  ;;  %v1712_v43 = vmax.f32 %v1644_v63, 0.0  ;;  %v1745_v16 = vpack.c.bf16 %v1711_v17, %v1709_v45  ;;  %v1596_v38 = vadd.f32 %v3523_v41, %v3787_v60  ;;  %v2608_v17 = vld [vmem:[%s3747_s5 + $0x64] ss:$8 sps:$4 sm:$0xff]   ;;  %v2617_v45 = vld [vmem:[%s3747_s5 + $0x70] ss:$8 sps:$4 sm:$0xff]  }
 0x2f8   : > { %v1647_v61 = vpop.f32.mrf.mxu1  ;;  %v1594_v63 = vadd.f32 %v3517_v0, %v3787_v60  ;;  %v2594_v0 = vld [vmem:[%s3747_s5] ss:$8 sps:$4 sm:$0xff]  }
 0x2f9   : > { %v1648_v58 = vadd.f32 %v1647_v61, %v3432_v18  ;;  %v1713_v28 = vmax.f32 %v1646_v31, 0.0  ;;  %v1697_v61 = vmax.f32 %v1606_v10, 0.0 }
 0x2fa   : > { %v1649_v4 = vpop.f32.mrf.mxu1  ;;  %v1692_v62 = vmax.f32 %v1594_v63, 0.0 }
 0x2fb   : > { %v1650_v30 = vadd.f32 %v1649_v4, %v3432_v18  ;;  %v1714_v47 = vmax.f32 %v1648_v58, 0.0  ;;  %v3782_v18 = vld [vmem:[#allocation3_spill] sm:$0xff]  ;;  %v1739_v58 = vpack.c.bf16 %v1699_v7, %v1697_v61  ;;  %v1693_v4 = vmax.f32 %v1596_v38, 0.0 }
 0x2fc   : > { %v1620_v34 = vadd.f32 %v1619_v25, %v3782_v18  ;;  %v1618_v48 = vadd.f32 %v1617_v52, %v3782_v18  ;;  %v1743_v25 = vpack.c.bf16 %v1707_v29, %v1705_v36  ;;  %v1608_v52 = vadd.f32 %v3537_v56, %v3784_v20 }
 0x2fd   : > { %v1715_v2 = vmax.f32 %v1650_v30, 0.0  ;;  %v1746_v32 = vpack.c.bf16 %v1714_v47, %v1712_v43  ;;  %v1598_v56 = vadd.f32 %v3527_v9, %v3786_v42  ;;  %v1737_v30 = vpack.c.bf16 %v1695_v3, %v1693_v4  ;;  %v2597_v47 = vld [vmem:[%s3747_s5 + $0x40] ss:$8 sps:$4 sm:$0xff]   ;;  %v2614_v43 = vld [vmem:[%s3747_s5 + $0x74] ss:$8 sps:$4 sm:$0xff]  }
 0x2fe   : > { %v1703_v21 = vmax.f32 %v1620_v34, 0.0  ;;  %v1702_v19 = vmax.f32 %v1618_v48, 0.0  ;;  %v1698_v15 = vmax.f32 %v1608_v52, 0.0 }
 0x2ff   : > { %v1747_v12 = vpack.c.bf16 %v1715_v2, %v1713_v28  ;;  %v1694_v41 = vmax.f32 %v1598_v56, 0.0  ;;  %v2610_v28 = vld [vmem:[%s3747_s5 + $0x20] ss:$8 sps:$4 sm:$0xff]  }
 0x300   : > { %v1741_v59 = vpack.c.bf16 %v1703_v21, %v1701_v1  ;;  %v1740_v31 = vpack.c.bf16 %v1702_v19, %v1700_v53  ;;  %v1738_v22 = vpack.c.bf16 %v1698_v15, %v1696_v13  ;;  %v2611_v2 = vld [vmem:[%s3747_s5 + $0x60] ss:$8 sps:$4 sm:$0xff]  }
 0x301   : > { %1956 = vmatprep.subr.bf16.mxu0 %v1747_v12  ;;  %2486 = vmatprep.subr.bf16.mxu1 %v1747_v12  ;;  %v1736_v9 = vpack.c.bf16 %v1694_v41, %v1692_v62  ;;  %v1783_v12 = vpop.permute.xlu0 %1782 }
 0x302   : > { %1957 = vmatpush2.bf16.msra.mxu0 %v1746_v32  ;;  %2502 = vmatpush2.bf16.msra.mxu1 %v1746_v32  ;;  %v1798_v32 = vpop.permute.xlu1 %1797 }
 0x303   : > { %1958 = vmatprep.subr.bf16.mxu0 %v1745_v16  ;;  %2487 = vmatprep.subr.bf16.mxu1 %v1745_v16 }
 0x305   : > { %v1793_v37 = vpop.permute.xlu0 %1792 }
 0x306   : > { %1959 = vmatpush2.bf16.msra.mxu0 %v1744_v57  ;;  %2503 = vmatpush2.bf16.msra.mxu1 %v1744_v57  ;;  %v3626_v34 = vpop.permute.xlu1 %2103 }
 0x307   : > { %1960 = vmatprep.subr.bf16.mxu0 %v1743_v25  ;;  %2488 = vmatprep.subr.bf16.mxu1 %v1743_v25 }
 0x309   : > { %v1803_v18 = vpop.permute.xlu0 %1802 }
 0x30a   : > { %1961 = vmatpush2.bf16.msra.mxu0 %v1742_v14  ;;  %2504 = vmatpush2.bf16.msra.mxu1 %v1742_v14  ;;  %v3628_v16 = vpop.permute.xlu1 %2113 }
 0x30b   : > { %1962 = vmatprep.subr.bf16.mxu0 %v1741_v59  ;;  %2489 = vmatprep.subr.bf16.mxu1 %v1741_v59 }
 0x30d   : > { %v2109_v29 = vpop.permute.xlu0 %2108 }
 0x30e   : > { %1963 = vmatpush2.bf16.msra.mxu0 %v1740_v31  ;;  %2505 = vmatpush2.bf16.msra.mxu1 %v1740_v31  ;;  %v3632_v49 = vpop.permute.xlu1 %2118 }
 0x30f   : > { %1964 = vmatprep.subr.bf16.mxu0 %v1739_v58  ;;  %2490 = vmatprep.subr.bf16.mxu1 %v1739_v58 }
 0x311   : > { %v3630_v5 = vpop.permute.xlu0 %1807 }
 0x312   : > { %1965 = vmatpush2.bf16.msra.mxu0 %v1738_v22  ;;  %2506 = vmatpush2.bf16.msra.mxu1 %v1738_v22  ;;  %v3636_v40 = vpop.permute.xlu1 %2123 }
 0x313   : > { %1966 = vmatprep.subr.bf16.mxu0 %v1737_v30  ;;  %2491 = vmatprep.subr.bf16.mxu1 %v1737_v30 }
 0x315   : > { %v3634_v35 = vpop.permute.xlu0 %1812 }
 0x316   : > { %1967 = vmatpush2.bf16.msra.mxu0 %v1736_v9  ;;  %2507 = vmatpush2.bf16.msra.mxu1 %v1736_v9  ;;  %v3640_v48 = vpop.permute.xlu1 %2128 }
 0x317   : > { %1968 = vmatprep.subr.bf16.mxu0 %v3525_v39  ;;  %2492 = vmatprep.subr.bf16.mxu1 %v3525_v39  ;;  %v2604_v39 = vld [vmem:[%s3747_s5 + $0x10] ss:$8 sps:$4 sm:$0xff]  }
 0x319   : > { %v3638_v36 = vpop.permute.xlu0 %1817 }
 0x31a   : > { %1969 = vmatpush2.bf16.msra.mxu0 %v3519_v23  ;;  %2508 = vmatpush2.bf16.msra.mxu1 %v3519_v23  ;;  %v2600_v23 = vld [vmem:[%s3747_s5 + $0x14] ss:$8 sps:$4 sm:$0xff]   ;;  %v3644_v57 = vpop.permute.xlu1 %2133 }
 0x31b   : > { %1970 = vmatprep.subr.bf16.mxu0 %v3501_v26  ;;  %2493 = vmatprep.subr.bf16.mxu1 %v3501_v26  ;;  %v2602_v26 = vld [vmem:[%s3747_s5 + $0x54] ss:$8 sps:$4 sm:$0xff]  }
 0x31d   : > { %v3642_v6 = vpop.permute.xlu0 %1822 }
 0x31e   : > { %1971 = vmatpush2.bf16.msra.mxu0 %v3495_v8  ;;  %2509 = vmatpush2.bf16.msra.mxu1 %v3495_v8  ;;  %v2605_v8 = vld [vmem:[%s3747_s5 + $0x50] ss:$8 sps:$4 sm:$0xff]   ;;  %v3654_v10 = vpop.permute.xlu1 %2138 }
 0x321   : > { %1973 = vmatmul.mubr.bf16.vlgmr.msra.gmra.mxu0 %v2594_v0  ;;  %2013 = vmatmul.mubr.bf16.vlgmr.msra.gmra.mxu1 %v2597_v47  ;;  %v3650_v33 = vpop.permute.xlu0 %1827 }
 0x322   : > { %1982 = vmatprep.mubr.bf16.mxu0 %v2600_v23  ;;  %2022 = vmatprep.mubr.bf16.mxu1 %v2602_v26  ;;  %v3664_v27 = vpop.permute.xlu1 %2143 }
 0x325   : > { %v3660_v42 = vpop.permute.xlu0 %1832 }
 0x326   : > { %v3674_v47 = vpop.permute.xlu1 %2148 }
 0x329   : > { %1983 = vmatmul.mubr.bf16.gmra.mxu0 %v2604_v39  ;;  %2023 = vmatmul.mubr.bf16.gmra.mxu1 %v2605_v8  ;;  %v3670_v4 = vpop.permute.xlu0 %1837 }
 0x32a   : > { %1992 = vmatprep.mubr.bf16.mxu0 %v2606_v11  ;;  %2032 = vmatprep.mubr.bf16.mxu1 %v2608_v17 }
 0x331   : > { %1993 = vmatmul.mubr.bf16.gmra.mxu0 %v2610_v28  ;;  %2033 = vmatmul.mubr.bf16.gmra.mxu1 %v2611_v2 }
 0x332   : > { %2002 = vmatprep.mubr.bf16.mxu0 %v2612_v24  ;;  %2042 = vmatprep.mubr.bf16.mxu1 %v2614_v43 }
 0x339   : > { %2003 = vmatmul.mubr.bf16.gmra.mxu0 %v2616_v46  ;;  %2043 = vmatmul.mubr.bf16.gmra.mxu1 %v2617_v45 }
 0x3e1   : > { %v1974_v20 = vpop.f32.mrf.mxu0  ;;  %v3646_v50 = vpop.f32.mrf.mxu1 }
 0x3e2   : > { %v1975_v53 = vadd.f32 %v1974_v20, %v1783_v12 }
 0x3e3   : > { %v1976_v21 = vpop.f32.mrf.mxu0  ;;  %v3648_v25 = vpop.f32.mrf.mxu1 }
 0x3e4   : > { %v1977_v15 = vadd.f32 %v1976_v21, %v1783_v12  ;;  %v2053_v41 = vmax.f32 %v1975_v53, 0.0 }
 0x3e5   : > { %v1978_v55 = vpop.f32.mrf.mxu0  ;;  %v3652_v54 = vpop.f32.mrf.mxu1 }
 0x3e6   : > { %v1979_v51 = vadd.f32 %v1978_v55, %v1788_v44  ;;  %v2054_v23 = vmax.f32 %v1977_v15, 0.0  ;;  %v2181_v2 = vmul.f32 %v3626_v34, %v2053_v41 }
 0x3e7   : > { %v1980_v1 = vpop.f32.mrf.mxu0  ;;  %v3656_v52 = vpop.f32.mrf.mxu1 }
 0x3e8   : > { %v1981_v60 = vadd.f32 %v1980_v1, %v1788_v44  ;;  %v2055_v31 = vmax.f32 %v1979_v51, 0.0  ;;  %v2182_v20 = vmul.f32 %v3626_v34, %v2054_v23  ;;  %v2017_v23 = vadd.f32 %v3648_v25, %v3642_v6 }
 0x3e9   : > { %v1984_v19 = vpop.f32.mrf.mxu0  ;;  %v3658_v14 = vpop.f32.mrf.mxu1 }
 0x3ea   : > { %v1985_v38 = vadd.f32 %v1984_v19, %v1793_v37  ;;  %v2056_v22 = vmax.f32 %v1981_v60, 0.0  ;;  %v2183_v39 = vmul.f32 %v2109_v29, %v2055_v31 }
 0x3eb   : > { %v1986_v7 = vpop.f32.mrf.mxu0  ;;  %v3662_v59 = vpop.f32.mrf.mxu1 }
 0x3ec   : > { %v1987_v3 = vadd.f32 %v1986_v7, %v1793_v37  ;;  %v2057_v30 = vmax.f32 %v1985_v38, 0.0  ;;  %v2184_v24 = vmul.f32 %v2109_v29, %v2056_v22  ;;  %v2213_v55 = vadd.f32 %v2183_v39, %v2181_v2  ;;  %v3688_v7 = vpop.permute.xlu1 %2153 }
 0x3ed   : > { %v1988_v61 = vpop.f32.mrf.mxu0  ;;  %v3666_v56 = vpop.f32.mrf.mxu1 }
 0x3ee   : > { %v1989_v58 = vadd.f32 %v1988_v61, %v1798_v32  ;;  %v2058_v8 = vmax.f32 %v1987_v3, 0.0  ;;  %v2185_v43 = vmul.f32 %v3628_v16, %v2057_v30  ;;  %v2234_v60 = vadd.f32 %v2184_v24, %v2182_v20 }
 0x3ef   : > { %v1990_v63 = vpop.f32.mrf.mxu0  ;;  %v3668_v13 = vpop.f32.mrf.mxu1  ;;  %v2070_v20 = vmax.f32 %v2017_v23, 0.0 }
 0x3f0   : > { %v1991_v62 = vadd.f32 %v1990_v63, %v1798_v32  ;;  %v2059_v11 = vmax.f32 %v1989_v58, 0.0  ;;  %v3682_v32 = vpop.permute.xlu0 %1842  ;;  %v2186_v1 = vmul.f32 %v3628_v16, %v2058_v8  ;;  %v2214_v38 = vadd.f32 %v2213_v55, %v2185_v43  ;;  %v2159_v43 = vpop.permute.xlu1 %2158 }
 0x3f1   : > { %v1994_v9 = vpop.f32.mrf.mxu0  ;;  %v3672_v0 = vpop.f32.mrf.mxu1  ;;  %v2015_v58 = vadd.f32 %v3646_v50, %v3642_v6  ;;  %v2025_v6 = vadd.f32 %v3658_v14, %v3660_v42  ;;  %v2027_v55 = vadd.f32 %v3662_v59, %v3660_v42 }
 0x3f2   : > { %v1995_v26 = vadd.f32 %v1994_v9, %v1803_v18  ;;  %v2060_v46 = vmax.f32 %v1991_v62, 0.0  ;;  %v2187_v19 = vmul.f32 %v3632_v49, %v2059_v11  ;;  %v2235_v63 = vadd.f32 %v2234_v60, %v2186_v1 }
 0x3f3   : > { %v1996_v17 = vpop.f32.mrf.mxu0  ;;  %v3676_v28 = vpop.f32.mrf.mxu1  ;;  %v2029_v1 = vadd.f32 %v3666_v56, %v3670_v4  ;;  %v2073_v42 = vmax.f32 %v2025_v6, 0.0 }
 0x3f4   : > { %v2061_v45 = vmax.f32 %v1995_v26, 0.0  ;;  %v1997_v12 = vadd.f32 %v1996_v17, %v1803_v18  ;;  %v2188_v61 = vmul.f32 %v3632_v49, %v2060_v46  ;;  %v2215_v41 = vadd.f32 %v2214_v38, %v2187_v19  ;;  %v1848_v30 = vpop.permute.xlu0 %1847  ;;  %v2164_v38 = vpop.permute.xlu1 %2163 }
 0x3f5   : > { %v1998_v44 = vpop.f32.mrf.mxu0  ;;  %v3680_v37 = vpop.f32.mrf.mxu1  ;;  %v2019_v26 = vadd.f32 %v3652_v54, %v3650_v33  ;;  %v2069_v46 = vmax.f32 %v2015_v58, 0.0  ;;  %v2198_v58 = vmul.f32 %v3664_v27, %v2070_v20 }
 0x3f6   : > { %v1999_v21 = vadd.f32 %v1998_v44, %v3630_v5  ;;  %v2062_v29 = vmax.f32 %v1997_v12, 0.0  ;;  %v2189_v34 = vmul.f32 %v3636_v40, %v2061_v45  ;;  %v2236_v39 = vadd.f32 %v2235_v63, %v2188_v61 }
 0x3f7   : > { %v2000_v51 = vpop.f32.mrf.mxu0  ;;  %v3693_v15 = vpop.f32.mrf.mxu1  ;;  %v2074_v61 = vmax.f32 %v2027_v55, 0.0 }
 0x3f8   : > { %v2063_v53 = vmax.f32 %v1999_v21, 0.0  ;;  %v2001_v18 = vadd.f32 %v2000_v51, %v3630_v5  ;;  %v2190_v22 = vmul.f32 %v3636_v40, %v2062_v29  ;;  %v2216_v8 = vadd.f32 %v2215_v41, %v2189_v34  ;;  %v1853_v51 = vpop.permute.xlu0 %1852 }
 0x3f9   : > { %v2004_v31 = vpop.f32.mrf.mxu0  ;;  %v2044_v50 = vpop.f32.mrf.mxu1  ;;  %v2071_v21 = vmax.f32 %v2019_v26, 0.0  ;;  %v2075_v34 = vmax.f32 %v2029_v1, 0.0 }
 0x3fa   : > { %v2064_v3 = vmax.f32 %v2001_v18, 0.0  ;;  %v2005_v16 = vadd.f32 %v2004_v31, %v3634_v35  ;;  %v2191_v62 = vmul.f32 %v3640_v48, %v2063_v53  ;;  %v2237_v25 = vadd.f32 %v2236_v39, %v2190_v22 }
 0x3fb   : > { %v2006_v5 = vpop.f32.mrf.mxu0  ;;  %v2035_v18 = vadd.f32 %v3672_v0, %v3682_v32  ;;  %v2037_v31 = vadd.f32 %v3676_v28, %v3682_v32 }
 0x3fc   : > { %v2065_v49 = vmax.f32 %v2005_v16, 0.0  ;;  %v2007_v9 = vadd.f32 %v2006_v5, %v3634_v35  ;;  %v2192_v17 = vmul.f32 %v3640_v48, %v2064_v3  ;;  %v2021_v35 = vadd.f32 %v3656_v52, %v3650_v33  ;;  %v2046_v33 = vpop.f32.mrf.mxu1  ;;  %v1858_v32 = vpop.permute.xlu0 %1857 }
 0x3fd   : > { %v2008_v11 = vpop.f32.mrf.mxu0  ;;  %v2217_v45 = vadd.f32 %v2216_v8, %v2191_v62  ;;  %v2039_v3 = vadd.f32 %v3680_v37, %v1848_v30  ;;  %v2077_v22 = vmax.f32 %v2035_v18, 0.0  ;;  %v2201_v5 = vmul.f32 %v3688_v7, %v2073_v42 }
 0x3fe   : > { %v2193_v40 = vmul.f32 %v3644_v57, %v2065_v49  ;;  %v2066_v2 = vmax.f32 %v2007_v9, 0.0  ;;  %v2009_v24 = vadd.f32 %v2008_v11, %v3638_v36  ;;  %v2238_v52 = vadd.f32 %v2237_v25, %v2192_v17  ;;  %v2048_v16 = vpop.f32.mrf.mxu1  ;;  %v2169_v17 = vpop.permute.xlu1 %2168 }
 0x3ff   : > { %v2010_v54 = vpop.f32.mrf.mxu0  ;;  %v2072_v53 = vmax.f32 %v2021_v35, 0.0  ;;  %v2045_v62 = vadd.f32 %v2044_v50, %v1853_v51  ;;  %v2202_v37 = vmul.f32 %v3688_v7, %v2074_v61  ;;  %v2203_v9 = vmul.f32 %v2159_v43, %v2075_v34 }
 0x400   : > { %v2194_v12 = vmul.f32 %v3644_v57, %v2066_v2  ;;  %v2067_v44 = vmax.f32 %v2009_v24, 0.0  ;;  %v2011_v48 = vadd.f32 %v2010_v54, %v3638_v36  ;;  %v2218_v19 = vadd.f32 %v2217_v45, %v2193_v40  ;;  %v2050_v26 = vpop.f32.mrf.mxu1 }
 0x401   : > { %v2197_v57 = vmul.f32 %v3664_v27, %v2069_v46  ;;  %v2031_v36 = vadd.f32 %v3668_v13, %v3670_v4  ;;  %v2199_v13 = vmul.f32 %v3674_v47, %v2071_v21  ;;  %v2200_v63 = vmul.f32 %v3674_v47, %v2072_v53 }
 0x402   : > { %v2195_v14 = vmul.f32 %v3654_v10, %v2067_v44  ;;  %v2068_v29 = vmax.f32 %v2011_v48, 0.0  ;;  %v2239_v59 = vadd.f32 %v2238_v52, %v2194_v12  ;;  %v2078_v27 = vmax.f32 %v2037_v31, 0.0  ;;  %v2174_v12 = vpop.permute.xlu0 %2173  ;;  %v2179_v1 = vpop.permute.xlu1 %2178 }
 0x403   : > { %v2076_v41 = vmax.f32 %v2031_v36, 0.0  ;;  %v2079_v23 = vmax.f32 %v2039_v3, 0.0  ;;  %v2047_v39 = vadd.f32 %v2046_v33, %v1853_v51  ;;  %v2049_v11 = vadd.f32 %v2048_v16, %v1858_v32 }
 0x404   : > { %v2219_v60 = vadd.f32 %v2218_v19, %v2195_v14  ;;  %v2196_v56 = vmul.f32 %v3654_v10, %v2068_v29  ;;  %v2041_v10 = vadd.f32 %v3693_v15, %v1848_v30  ;;  %v2205_v2 = vmul.f32 %v2164_v38, %v2077_v22 }
 0x405   : > { %v2204_v40 = vmul.f32 %v2159_v43, %v2076_v41  ;;  %v2081_v30 = vmax.f32 %v2045_v62, 0.0  ;;  %v2051_v46 = vadd.f32 %v2050_v26, %v1858_v32  ;;  %v2206_v35 = vmul.f32 %v2164_v38, %v2078_v27 }
 0x406   : > { %v2220_v4 = vadd.f32 %v2219_v60, %v2197_v57  ;;  %v2240_v0 = vadd.f32 %v2239_v59, %v2196_v56  ;;  %v2080_v15 = vmax.f32 %v2041_v10, 0.0  ;;  %v2207_v6 = vmul.f32 %v2169_v17, %v2079_v23 }
 0x407   : > { %v2082_v25 = vmax.f32 %v2047_v39, 0.0  ;;  %v2083_v7 = vmax.f32 %v2049_v11, 0.0  ;;  %v2209_v48 = vmul.f32 %v2174_v12, %v2081_v30  ;;  %v2084_v21 = vmax.f32 %v2051_v46, 0.0 }
 0x408   : > { %v2221_v49 = vadd.f32 %v2220_v4, %v2199_v13  ;;  %v2241_v28 = vadd.f32 %v2240_v0, %v2198_v58  ;;  %v2208_v44 = vmul.f32 %v2169_v17, %v2080_v15  ;;  %v2261_v57 = vlaneseq  ;;  %v2259_v13 = vpop.permute.xlu0 %2258 }
 0x409   : > { %v2210_v43 = vmul.f32 %v2174_v12, %v2082_v25  ;;  %v2211_v33 = vmul.f32 %v2179_v1, %v2083_v7  ;;  %v2212_v29 = vmul.f32 %v2179_v1, %v2084_v21  ;;  %v2627_v38 = vmov 1966171168  }
 0x40a   : > { %v2222_v8 = vadd.f32 %v2221_v49, %v2201_v5  ;;  %v2242_v47 = vadd.f32 %v2241_v28, %v2200_v63  ;;  %v2262_v59 = vshrl.u32 %v2261_v57, 7  ;;  %v2271_v61 = vunpack.c.l.s4 %v2627_v38 }
 0x40b   : > { %vm2287_vm1 = vcmp.lt.s32.totalorder %v2261_v57, 256 }
 0x40c   : > { %v2223_v24 = vadd.f32 %v2222_v8, %v2203_v9  ;;  %v2243_v50 = vadd.f32 %v2242_v47, %v2202_v37  ;;  %v2263_v3 = vsub.s32 0, %v2262_v59  ;;  %v2272_v4 = vunpack.c.0.s8 %v2271_v61 }
 0x40e   : > { %v2224_v54 = vadd.f32 %v2223_v24, %v2205_v2  ;;  %v2244_v45 = vadd.f32 %v2243_v50, %v2204_v40  ;;  %v2264_v41 = vrot.slane %v2259_v13, %v2263_v3  ;;  %v2275_v10 = vsub.s32 %v2272_v4, %v2262_v59 }
 0x410   : > { %v2225_v20 = vadd.f32 %v2224_v54, %v2207_v6  ;;  %v2245_v55 = vadd.f32 %v2244_v45, %v2206_v35 }
 0x412   : > { %v2226_v52 = vadd.f32 %v2225_v20, %v2209_v48  ;;  %v2246_v19 = vadd.f32 %v2245_v55, %v2208_v44 }
 0x414   : > { %v2227_v14 = vadd.f32 %v2226_v52, %v2211_v33  ;;  %v2247_v51 = vadd.f32 %v2246_v19, %v2210_v43 }
 0x416   : > { %v2228_v53 = vrot.slane %v2227_v14, 4  ;;  %v2248_v36 = vadd.f32 %v2247_v51, %v2212_v29 }
 0x418   : > { %v2229_v18 = vadd.f32 %v2228_v53, %v2227_v14  ;;  %v2249_v42 = vrot.slane %v2248_v36, 4 }
 0x41a   : > { %v2230_v60 = vrot.slane %v2229_v18, 2  ;;  %v2250_v56 = vadd.f32 %v2249_v42, %v2248_v36 }
 0x41c   : > { %v2231_v34 = vadd.f32 %v2230_v60, %v2229_v18  ;;  %v2251_v31 = vrot.slane %v2250_v56, 2 }
 0x41e   : > { %v2232_v16 = vrot.slane %v2231_v34, 1  ;;  %v2252_v58 = vadd.f32 %v2251_v31, %v2250_v56 }
 0x420   : > { %v2233_v0 = vadd.f32 %v2232_v16, %v2231_v34  ;;  %v2253_v63 = vrot.slane %v2252_v58, 1 }
 0x422   : > { %v2254_v22 = vadd.f32 %v2253_v63, %v2252_v58  ;;  %v2265_v5 = vadd.f32 %v2264_v41, %v2233_v0 }
 0x424   : > { %v2266_v62 = vadd.f32 %v2264_v41, %v2254_v22 }
 0x426   : > { %v2269_v49 = vcombine.low %v2265_v5, %v2266_v62 }
 0x428   : > { %v2276_v28 = vrot.slane %v2269_v49, %v2275_v10 }
 0x42a   : > { %v2283_v32 = vrot.slane %v2276_v28, %v2275_v10 }
 0x42c   : > { %2289 = vst.msk [vmem:[%s334_s22] sm:$0x3] %vm2287_vm1, %v2283_v32 }
 0x42d PF: > { %s21_s11 = sadd.s32 1, %s2624_s11  }
 0x42e   : > { %p18_p5 = scmp.ge.s32.totalorder %s21_s11, 4  }
 0x430   :  { %20 = sbr.rel (!%p18_p5) target bundleno = 3 (0x3), region = 86 }

</bundles_post_ra>
